<compile_context>
chip_gen: v7x
topology: tpu7x:2x2x1
jax: 0.10.0
libtpu: 0.0.40
codegen_flags: <defaults>
</compile_context>

<pallas_src>
import jax
import jax.numpy as jnp
from jax.experimental import pallas as pl
from jax.experimental.pallas import tpu as pltpu

# ---- scaled-down bert-base-cased config ----
VOCAB = 100
TYPE_VOCAB = 2
MAX_POS = 16
HIDDEN = 128
N_LAYERS = 2
N_HEADS = 2
HEAD_DIM = HIDDEN // N_HEADS
INTERMEDIATE = 512
N_TARGETS = 80
PAD_TARGETS = 128          # classifier output padded to a full 128-lane vreg
DROPOUT_RATE = 0.5
LN_EPS = 1e-12

VMEM_SPEC = pl.BlockSpec(memory_space=pltpu.MemorySpace.VMEM)


# ----------------------------- in-kernel helpers -----------------------------

def _layer_norm(h, g, b):
    mu = jnp.mean(h, axis=-1, keepdims=True)
    var = jnp.mean((h - mu) ** 2, axis=-1, keepdims=True)
    return (h - mu) * jax.lax.rsqrt(var + LN_EPS) * g + b


def _gelu(y):
    # TODO(synk): HF BERT uses exact erf-GELU; tanh approximation used here.
    return 0.5 * y * (1.0 + jnp.tanh(0.7978845608028654 * (y + 0.044715 * y * y * y)))


# ----------------------------- Pallas kernels -----------------------------

def embed_layernorm_kernel(x_ref, g_ref, b_ref, o_ref):
    o_ref[...] = _layer_norm(x_ref[...], g_ref[...], b_ref[...])


def encoder_kernel(x_ref, am_ref,
                   wqkv_ref, bqkv_ref, wo_ref, bo_ref, ln1g_ref, ln1b_ref,
                   w1_ref, b1_ref, w2_ref, b2_ref, ln2g_ref, ln2b_ref,
                   o_ref):
    """One fused encoder layer for one batch element.  grid = (batch, layer)."""
    # Initialize the resident activation from the embeddings on the first layer.
    @pl.when(pl.program_id(1) == 0)
    def _():
        o_ref[...] = x_ref[...]

    h = o_ref[0]                                           # (S, H) running activation
    am = am_ref[0]                                         # (1, S) additive key mask

    # --- self-attention: fused QKV projection, all heads, lane-dense context ---
    qkv = jnp.dot(h, wqkv_ref[0], preferred_element_type=jnp.float32) + bqkv_ref[0]
    scale = 1.0 / (HEAD_DIM ** 0.5)
    head_ctx = []
    for hi in range(N_HEADS):                              # static unroll (N_HEADS=2)
        qh = qkv[:, hi * HEAD_DIM:(hi + 1) * HEAD_DIM]
        kh = qkv[:, HIDDEN + hi * HEAD_DIM:HIDDEN + (hi + 1) * HEAD_DIM]
        vh = qkv[:, 2 * HIDDEN + hi * HEAD_DIM:2 * HIDDEN + (hi + 1) * HEAD_DIM]
        s = jax.lax.dot_general(qh, kh, (((1,), (1,)), ((), ())),
                                preferred_element_type=jnp.float32) * scale
        s = s + am                                         # broadcast over query rows
        s = s - jnp.max(s, axis=-1, keepdims=True)
        p = jnp.exp(s)
        p = p / jnp.sum(p, axis=-1, keepdims=True)
        head_ctx.append(jnp.dot(p, vh, preferred_element_type=jnp.float32))
    ctx = jnp.concatenate(head_ctx, axis=-1)               # (S, H) lane-dense

    attn_out = jnp.dot(ctx, wo_ref[0], preferred_element_type=jnp.float32) + bo_ref[0]
    h1 = _layer_norm(attn_out + h, ln1g_ref[0], ln1b_ref[0])

    # --- FFN with fused bias + GELU + add + LayerNorm epilogue ---
    ffn = jnp.dot(h1, w1_ref[0], preferred_element_type=jnp.float32) + b1_ref[0]
    ffn = _gelu(ffn)
    ffn = jnp.dot(ffn, w2_ref[0], preferred_element_type=jnp.float32) + b2_ref[0]
    o_ref[0] = _layer_norm(ffn + h1, ln2g_ref[0], ln2b_ref[0])


def head_kernel(cls_ref, wp_ref, bp_ref, drop_ref, wc_ref, bc_ref, o_ref):
    """Pooler tanh + dropout (precomputed mask) + classifier (padded) + ReLU."""
    pooled = jnp.tanh(
        jnp.dot(cls_ref[...], wp_ref[...], preferred_element_type=jnp.float32)
        + bp_ref[...])
    dropped = pooled * drop_ref[...]
    out = jnp.dot(dropped, wc_ref[...], preferred_element_type=jnp.float32) + bc_ref[...]
    o_ref[...] = jnp.maximum(out, 0.0)


# ----------------------------- wrappers -----------------------------

def embed_layernorm(x, g, b):
    return pl.pallas_call(
        embed_layernorm_kernel,
        out_shape=jax.ShapeDtypeStruct(x.shape, jnp.float32),
        in_specs=[VMEM_SPEC, VMEM_SPEC, VMEM_SPEC],
        out_specs=VMEM_SPEC,
    )(x, g, b)


def encoder(x, amask, p):
    """x: (B, S, H) embeddings; amask: (B, 1, S) additive mask."""
    B, S, _ = x.shape

    def wspec(shape):
        # stacked per-layer weight: pick layer l's slab, keep it whole in VMEM.
        return pl.BlockSpec((1,) + shape, lambda b, l: (l, 0, 0))

    return pl.pallas_call(
        encoder_kernel,
        out_shape=jax.ShapeDtypeStruct((B, S, HIDDEN), jnp.float32),
        grid=(B, N_LAYERS),
        in_specs=[
            pl.BlockSpec((1, S, HIDDEN), lambda b, l: (b, 0, 0)),   # embeddings
            pl.BlockSpec((1, 1, S), lambda b, l: (b, 0, 0)),        # additive mask
            wspec((HIDDEN, 3 * HIDDEN)),                            # wqkv
            wspec((1, 3 * HIDDEN)),                                 # bqkv
            wspec((HIDDEN, HIDDEN)),                                # wo
            wspec((1, HIDDEN)),                                     # bo
            wspec((1, HIDDEN)),                                     # ln1_g
            wspec((1, HIDDEN)),                                     # ln1_b
            wspec((HIDDEN, INTERMEDIATE)),                          # w1
            wspec((1, INTERMEDIATE)),                               # b1
            wspec((INTERMEDIATE, HIDDEN)),                          # w2
            wspec((1, HIDDEN)),                                     # b2
            wspec((1, HIDDEN)),                                     # ln2_g
            wspec((1, HIDDEN)),                                     # ln2_b
        ],
        out_specs=pl.BlockSpec((1, S, HIDDEN), lambda b, l: (b, 0, 0)),
        compiler_params=pltpu.CompilerParams(
            dimension_semantics=("parallel", "arbitrary")),
        # TODO(synk): at real BERT-base sizes switch to gridded row/col tiles and
        # set vmem_limit_bytes explicitly (v7x has only 64 MiB VMEM).
    )(x, amask, p["wqkv"], p["bqkv"], p["wo"], p["bo"],
      p["ln1_g"], p["ln1_b"], p["w1"], p["b1"], p["w2"], p["b2"],
      p["ln2_g"], p["ln2_b"])


def head(cls, wp, bp, drop_scale, wc_pad, bc_pad):
    B = cls.shape[0]
    return pl.pallas_call(
        head_kernel,
        out_shape=jax.ShapeDtypeStruct((B, PAD_TARGETS), jnp.float32),
        in_specs=[VMEM_SPEC] * 6,
        out_specs=VMEM_SPEC,
    )(cls, wp, bp, drop_scale, wc_pad, bc_pad)


# ----------------------------- parameters -----------------------------

def init_params(key):
    keys = iter(jax.random.split(key, 16))

    def nrm(shape, std=0.02):
        return std * jax.random.normal(next(keys), shape, dtype=jnp.float32)

    wc = nrm((HIDDEN, N_TARGETS))
    bc = jnp.zeros((1, N_TARGETS), jnp.float32)
    return {
        "word_emb": nrm((VOCAB, HIDDEN)),
        "pos_emb": nrm((MAX_POS, HIDDEN)),
        "type_emb": nrm((TYPE_VOCAB, HIDDEN)),
        "emb_ln_g": jnp.ones((1, HIDDEN), jnp.float32),
        "emb_ln_b": jnp.zeros((1, HIDDEN), jnp.float32),
        # stacked per-layer encoder weights (leading axis = layer); QKV fused.
        "wqkv": nrm((N_LAYERS, HIDDEN, 3 * HIDDEN)),
        "bqkv": jnp.zeros((N_LAYERS, 1, 3 * HIDDEN), jnp.float32),
        "wo": nrm((N_LAYERS, HIDDEN, HIDDEN)),
        "bo": jnp.zeros((N_LAYERS, 1, HIDDEN), jnp.float32),
        "ln1_g": jnp.ones((N_LAYERS, 1, HIDDEN), jnp.float32),
        "ln1_b": jnp.zeros((N_LAYERS, 1, HIDDEN), jnp.float32),
        "w1": nrm((N_LAYERS, HIDDEN, INTERMEDIATE)),
        "b1": jnp.zeros((N_LAYERS, 1, INTERMEDIATE), jnp.float32),
        "w2": nrm((N_LAYERS, INTERMEDIATE, HIDDEN)),
        "b2": jnp.zeros((N_LAYERS, 1, HIDDEN), jnp.float32),
        "ln2_g": jnp.ones((N_LAYERS, 1, HIDDEN), jnp.float32),
        "ln2_b": jnp.zeros((N_LAYERS, 1, HIDDEN), jnp.float32),
        # pooler (Linear(hidden, hidden) + tanh)
        "wp": nrm((HIDDEN, HIDDEN)),
        "bp": jnp.zeros((1, HIDDEN), jnp.float32),
        # hidden2target (Linear(hidden, 80)) zero-padded to 128 output lanes
        "wc_pad": jnp.pad(wc, ((0, 0), (0, PAD_TARGETS - N_TARGETS))),
        "bc_pad": jnp.pad(bc, ((0, 0), (0, PAD_TARGETS - N_TARGETS))),
    }


# ----------------------------- forward -----------------------------

def bert_classifier_forward(params, input_id, mask, dropout_key):
    B, S = input_id.shape

    # --- embeddings (gather is XLA glue; normalization is a Pallas kernel) ---
    x = (params["word_emb"][input_id]
         + params["pos_emb"][jnp.arange(S)][None, :, :]
         + params["type_emb"][jnp.zeros((B, S), jnp.int32)])
    x2d = x.reshape(B * S, HIDDEN).astype(jnp.float32)
    x2d = embed_layernorm(x2d, params["emb_ln_g"], params["emb_ln_b"])
    x3d = x2d.reshape(B, S, HIDDEN)

    # additive attention mask, kept as (B, 1, S) and broadcast inside the kernel
    amask = (mask.astype(jnp.float32) - 1.0)[:, None, :] * 10000.0

    # --- full encoder (all layers) in ONE pallas_call ---
    seq_out = encoder(x3d, amask, params)                  # (B, S, HIDDEN)

    # --- pooler + dropout + classifier head in ONE pallas_call ---
    cls = seq_out[:, 0, :]                                 # (B, HIDDEN)
    # dropout mask generated with jax.random (pltpu PRNG has no CPU/interpret
    # lowering); applied inside the fused head kernel. Training-mode semantics.
    keep = jax.random.bernoulli(dropout_key, 1.0 - DROPOUT_RATE, (B, HIDDEN))
    drop_scale = keep.astype(jnp.float32) / (1.0 - DROPOUT_RATE)

    out_pad = head(cls, params["wp"], params["bp"], drop_scale,
                   params["wc_pad"], params["bc_pad"])     # (B, 128) lane-dense
    return out_pad[:, :N_TARGETS]                          # (B, 80)


# ----------------------------- main -----------------------------

if __name__ == "__main__":
    key = jax.random.PRNGKey(0)
    pkey, ikey, dkey = jax.random.split(key, 3)
    params = init_params(pkey)

    B, S = 2, 8
    input_id = jax.random.randint(ikey, (B, S), 0, VOCAB, dtype=jnp.int32)
    mask = jnp.ones((B, S), jnp.int32).at[1, 6:].set(0)    # pad last 2 tokens of example 1

    fwd = jax.jit(bert_classifier_forward)
    out = fwd(params, input_id, mask, dkey)
    out = jax.block_until_ready(out)

    assert out.shape == (B, N_TARGETS), out.shape
    assert bool(jnp.all(out >= 0.0))                       # ReLU output
    print("KERNEL_OK")
</pallas_src>

<mosaic_0001>
module attributes {stable_mosaic.version = 11 : i64} {
  func.func @embed_layernorm_kernel(%arg0: memref<16x128xf32, #tpu.memory_space<vmem>>, %arg1: memref<1x128xf32, #tpu.memory_space<vmem>>, %arg2: memref<1x128xf32, #tpu.memory_space<vmem>>, %arg3: memref<16x128xf32, #tpu.memory_space<vmem>>) attributes {dimension_semantics = [], scalar_prefetch = 0 : i64, scratch_operands = 0 : i64, tpu.core_type = #tpu.core_type<tc>} {
    %c0 = arith.constant 0 : index
    %c0_0 = arith.constant 0 : index
    %0 = vector.load %arg0[%c0, %c0_0] : memref<16x128xf32, #tpu.memory_space<vmem>>, vector<16x128xf32>
    %c0_1 = arith.constant 0 : index
    %c0_2 = arith.constant 0 : index
    %1 = vector.load %arg1[%c0_1, %c0_2] : memref<1x128xf32, #tpu.memory_space<vmem>>, vector<1x128xf32>
    %c0_3 = arith.constant 0 : index
    %c0_4 = arith.constant 0 : index
    %2 = vector.load %arg2[%c0_3, %c0_4] : memref<1x128xf32, #tpu.memory_space<vmem>>, vector<1x128xf32>
    %cst = arith.constant dense<0.000000e+00> : vector<16xf32>
    %3 = vector.multi_reduction <add>, %0, %cst [1] : vector<16x128xf32> to vector<16xf32>
    %4 = vector.shape_cast %3 : vector<16xf32> to vector<16x1xf32>
    %cst_5 = arith.constant 1.280000e+02 : f32
    %5 = vector.broadcast %cst_5 : f32 to vector<16x1xf32>
    %6 = arith.divf %4, %5 : vector<16x1xf32>
    %7 = vector.broadcast %6 : vector<16x1xf32> to vector<16x128xf32>
    %8 = arith.subf %0, %7 : vector<16x128xf32>
    %9 = arith.mulf %8, %8 : vector<16x128xf32>
    %cst_6 = arith.constant dense<0.000000e+00> : vector<16xf32>
    %10 = vector.multi_reduction <add>, %9, %cst_6 [1] : vector<16x128xf32> to vector<16xf32>
    %11 = vector.shape_cast %10 : vector<16xf32> to vector<16x1xf32>
    %cst_7 = arith.constant 1.280000e+02 : f32
    %12 = vector.broadcast %cst_7 : f32 to vector<16x1xf32>
    %13 = arith.divf %11, %12 : vector<16x1xf32>
    %14 = vector.broadcast %6 : vector<16x1xf32> to vector<16x128xf32>
    %15 = arith.subf %0, %14 : vector<16x128xf32>
    %cst_8 = arith.constant 9.99999996E-13 : f32
    %16 = vector.broadcast %cst_8 : f32 to vector<16x1xf32>
    %17 = arith.addf %13, %16 : vector<16x1xf32>
    %18 = math.rsqrt %17 : vector<16x1xf32>
    %19 = vector.broadcast %18 : vector<16x1xf32> to vector<16x128xf32>
    %20 = arith.mulf %15, %19 : vector<16x128xf32>
    %21 = vector.broadcast %1 : vector<1x128xf32> to vector<16x128xf32>
    %22 = arith.mulf %20, %21 : vector<16x128xf32>
    %23 = vector.broadcast %2 : vector<1x128xf32> to vector<16x128xf32>
    %24 = arith.addf %22, %23 : vector<16x128xf32>
    %c0_9 = arith.constant 0 : index
    %c0_10 = arith.constant 0 : index
    %25 = vector.load %arg3[%c0_9, %c0_10] : memref<16x128xf32, #tpu.memory_space<vmem>>, vector<16x128xf32>
    tpu.vector_store %arg3[%c0_9, %c0_10], %24 {strides = array<i32>} : memref<16x128xf32, #tpu.memory_space<vmem>>, vector<16x128xf32>,
    return
  }
}

module attributes {stable_mosaic.version = 11 : i64} {
  func.func @encoder_kernel(%arg0: i32, %arg1: i32, %arg2: memref<1x8x128xf32, #tpu.memory_space<vmem>>, %arg3: memref<1x1x8xf32, #tpu.memory_space<vmem>>, %arg4: memref<1x128x384xf32, #tpu.memory_space<vmem>>, %arg5: memref<1x1x384xf32, #tpu.memory_space<vmem>>, %arg6: memref<1x128x128xf32, #tpu.memory_space<vmem>>, %arg7: memref<1x1x128xf32, #tpu.memory_space<vmem>>, %arg8: memref<1x1x128xf32, #tpu.memory_space<vmem>>, %arg9: memref<1x1x128xf32, #tpu.memory_space<vmem>>, %arg10: memref<1x128x512xf32, #tpu.memory_space<vmem>>, %arg11: memref<1x1x512xf32, #tpu.memory_space<vmem>>, %arg12: memref<1x512x128xf32, #tpu.memory_space<vmem>>, %arg13: memref<1x1x128xf32, #tpu.memory_space<vmem>>, %arg14: memref<1x1x128xf32, #tpu.memory_space<vmem>>, %arg15: memref<1x1x128xf32, #tpu.memory_space<vmem>>, %arg16: memref<1x8x128xf32, #tpu.memory_space<vmem>>) attributes {dimension_semantics = [#tpu.dimension_semantics<parallel>, #tpu.dimension_semantics<arbitrary>], iteration_bounds = array<i64: 2, 2>, scalar_prefetch = 0 : i64, scratch_operands = 0 : i64, tpu.core_type = #tpu.core_type<tc>, window_params = [{transform_indices = @transform_0, window_bounds = array<i64: 1, 8, 128>}, {transform_indices = @transform_1, window_bounds = array<i64: 1, 1, 8>}, {transform_indices = @transform_2, window_bounds = array<i64: 1, 128, 384>}, {transform_indices = @transform_3, window_bounds = array<i64: 1, 1, 384>}, {transform_indices = @transform_4, window_bounds = array<i64: 1, 128, 128>}, {transform_indices = @transform_5, window_bounds = array<i64: 1, 1, 128>}, {transform_indices = @transform_6, window_bounds = array<i64: 1, 1, 128>}, {transform_indices = @transform_7, window_bounds = array<i64: 1, 1, 128>}, {transform_indices = @transform_8, window_bounds = array<i64: 1, 128, 512>}, {transform_indices = @transform_9, window_bounds = array<i64: 1, 1, 512>}, {transform_indices = @transform_10, window_bounds = array<i64: 1, 512, 128>}, {transform_indices = @transform_11, window_bounds = array<i64: 1, 1, 128>}, {transform_indices = @transform_12, window_bounds = array<i64: 1, 1, 128>}, {transform_indices = @transform_13, window_bounds = array<i64: 1, 1, 128>}, {transform_indices = @transform_14, window_bounds = array<i64: 1, 8, 128>}]} {
    %c0_i32 = arith.constant 0 : i32
    %0 = arith.cmpi eq, %arg1, %c0_i32 : i32
    %1 = arith.extui %0 : i1 to i32
    %c0_i32_0 = arith.constant 0 : i32
    %2 = arith.cmpi ne, %1, %c0_i32_0 : i32
    scf.if %2 {
      %c0_72 = arith.constant 0 : index
      %c0_73 = arith.constant 0 : index
      %c0_74 = arith.constant 0 : index
      %142 = vector.load %arg2[%c0_72, %c0_73, %c0_74] : memref<1x8x128xf32, #tpu.memory_space<vmem>>, vector<1x8x128xf32>
      %c0_75 = arith.constant 0 : index
      %c0_76 = arith.constant 0 : index
      %c0_77 = arith.constant 0 : index
      %143 = vector.load %arg16[%c0_75, %c0_76, %c0_77] : memref<1x8x128xf32, #tpu.memory_space<vmem>>, vector<1x8x128xf32>
      tpu.vector_store %arg16[%c0_75, %c0_76, %c0_77], %142 {strides = array<i32>} : memref<1x8x128xf32, #tpu.memory_space<vmem>>, vector<1x8x128xf32>,
    } else {
    }
    %c0 = arith.constant 0 : index
    %c0_1 = arith.constant 0 : index
    %c0_2 = arith.constant 0 : index
    %3 = vector.load %arg16[%c0, %c0_1, %c0_2] : memref<1x8x128xf32, #tpu.memory_space<vmem>>, vector<1x8x128xf32>
    %4 = vector.shape_cast %3 : vector<1x8x128xf32> to vector<8x128xf32>
    %c0_3 = arith.constant 0 : index
    %c0_4 = arith.constant 0 : index
    %c0_5 = arith.constant 0 : index
    %5 = vector.load %arg3[%c0_3, %c0_4, %c0_5] : memref<1x1x8xf32, #tpu.memory_space<vmem>>, vector<1x1x8xf32>
    %6 = vector.shape_cast %5 : vector<1x1x8xf32> to vector<1x8xf32>
    %c0_6 = arith.constant 0 : index
    %c0_7 = arith.constant 0 : index
    %c0_8 = arith.constant 0 : index
    %7 = vector.load %arg4[%c0_6, %c0_7, %c0_8] : memref<1x128x384xf32, #tpu.memory_space<vmem>>, vector<1x128x384xf32>
    %8 = vector.shape_cast %7 : vector<1x128x384xf32> to vector<128x384xf32>
    %cst = arith.constant dense<0.000000e+00> : vector<8x384xf32>
    %9 = tpu.matmul %4, %8, %cst {dimension_numbers = #tpu.dot_dimension_numbers<[1], [0], [0], [1], [0, 0, 1, 1], [], []>} : vector<8x128xf32>, vector<128x384xf32>, vector<8x384xf32> -> vector<8x384xf32>
    %c0_9 = arith.constant 0 : index
    %c0_10 = arith.constant 0 : index
    %c0_11 = arith.constant 0 : index
    %10 = vector.load %arg5[%c0_9, %c0_10, %c0_11] : memref<1x1x384xf32, #tpu.memory_space<vmem>>, vector<1x1x384xf32>
    %11 = vector.shape_cast %10 : vector<1x1x384xf32> to vector<1x384xf32>
    %12 = vector.broadcast %11 : vector<1x384xf32> to vector<8x384xf32>
    %13 = arith.addf %9, %12 : vector<8x384xf32>
    %14 = vector.extract_strided_slice %13 {offsets = [0, 0], sizes = [8, 64], strides = [1, 1]} : vector<8x384xf32> to vector<8x64xf32>
    %15 = vector.extract_strided_slice %13 {offsets = [0, 128], sizes = [8, 64], strides = [1, 1]} : vector<8x384xf32> to vector<8x64xf32>
    %16 = vector.extract_strided_slice %13 {offsets = [0, 256], sizes = [8, 64], strides = [1, 1]} : vector<8x384xf32> to vector<8x64xf32>
    %cst_12 = arith.constant dense<0.000000e+00> : vector<8x8xf32>
    %17 = tpu.matmul %14, %15, %cst_12 {dimension_numbers = #tpu.dot_dimension_numbers<[1], [1], [0], [0], [0, 0, 1, 0], [], []>} : vector<8x64xf32>, vector<8x64xf32>, vector<8x8xf32> -> vector<8x8xf32>
    %cst_13 = arith.constant 1.250000e-01 : f32
    %18 = vector.broadcast %cst_13 : f32 to vector<8x8xf32>
    %19 = arith.mulf %17, %18 : vector<8x8xf32>
    %20 = vector.broadcast %6 : vector<1x8xf32> to vector<8x8xf32>
    %21 = arith.addf %19, %20 : vector<8x8xf32>
    %cst_14 = arith.constant dense<0xFF800000> : vector<8xf32>
    %22 = vector.multi_reduction <maximumf>, %21, %cst_14 [1] : vector<8x8xf32> to vector<8xf32>
    %23 = vector.shape_cast %22 : vector<8xf32> to vector<8x1xf32>
    %24 = vector.broadcast %23 : vector<8x1xf32> to vector<8x8xf32>
    %25 = arith.subf %21, %24 : vector<8x8xf32>
    %26 = math.exp %25 : vector<8x8xf32>
    %cst_15 = arith.constant dense<0.000000e+00> : vector<8xf32>
    %27 = vector.multi_reduction <add>, %26, %cst_15 [1] : vector<8x8xf32> to vector<8xf32>
    %28 = vector.shape_cast %27 : vector<8xf32> to vector<8x1xf32>
    %29 = vector.broadcast %28 : vector<8x1xf32> to vector<8x8xf32>
    %30 = arith.divf %26, %29 : vector<8x8xf32>
    %cst_16 = arith.constant dense<0.000000e+00> : vector<8x64xf32>
    %31 = tpu.matmul %30, %16, %cst_16 {dimension_numbers = #tpu.dot_dimension_numbers<[1], [0], [0], [1], [0, 0, 1, 1], [], []>} : vector<8x8xf32>, vector<8x64xf32>, vector<8x64xf32> -> vector<8x64xf32>
    %32 = vector.extract_strided_slice %13 {offsets = [0, 64], sizes = [8, 64], strides = [1, 1]} : vector<8x384xf32> to vector<8x64xf32>
    %33 = vector.extract_strided_slice %13 {offsets = [0, 192], sizes = [8, 64], strides = [1, 1]} : vector<8x384xf32> to vector<8x64xf32>
    %34 = vector.extract_strided_slice %13 {offsets = [0, 320], sizes = [8, 64], strides = [1, 1]} : vector<8x384xf32> to vector<8x64xf32>
    %cst_17 = arith.constant dense<0.000000e+00> : vector<8x8xf32>
    %35 = tpu.matmul %32, %33, %cst_17 {dimension_numbers = #tpu.dot_dimension_numbers<[1], [1], [0], [0], [0, 0, 1, 0], [], []>} : vector<8x64xf32>, vector<8x64xf32>, vector<8x8xf32> -> vector<8x8xf32>
    %cst_18 = arith.constant 1.250000e-01 : f32
    %36 = vector.broadcast %cst_18 : f32 to vector<8x8xf32>
    %37 = arith.mulf %35, %36 : vector<8x8xf32>
    %38 = vector.broadcast %6 : vector<1x8xf32> to vector<8x8xf32>
    %39 = arith.addf %37, %38 : vector<8x8xf32>
    %cst_19 = arith.constant dense<0xFF800000> : vector<8xf32>
    %40 = vector.multi_reduction <maximumf>, %39, %cst_19 [1] : vector<8x8xf32> to vector<8xf32>
    %41 = vector.shape_cast %40 : vector<8xf32> to vector<8x1xf32>
    %42 = vector.broadcast %41 : vector<8x1xf32> to vector<8x8xf32>
    %43 = arith.subf %39, %42 : vector<8x8xf32>
    %44 = math.exp %43 : vector<8x8xf32>
    %cst_20 = arith.constant dense<0.000000e+00> : vector<8xf32>
    %45 = vector.multi_reduction <add>, %44, %cst_20 [1] : vector<8x8xf32> to vector<8xf32>
    %46 = vector.shape_cast %45 : vector<8xf32> to vector<8x1xf32>
    %47 = vector.broadcast %46 : vector<8x1xf32> to vector<8x8xf32>
    %48 = arith.divf %44, %47 : vector<8x8xf32>
    %cst_21 = arith.constant dense<0.000000e+00> : vector<8x64xf32>
    %49 = tpu.matmul %48, %34, %cst_21 {dimension_numbers = #tpu.dot_dimension_numbers<[1], [0], [0], [1], [0, 0, 1, 1], [], []>} : vector<8x8xf32>, vector<8x64xf32>, vector<8x64xf32> -> vector<8x64xf32>
    %50 = tpu.concatenate %31, %49 in 1 : vector<8x64xf32>, vector<8x64xf32> -> vector<8x128xf32>
    %c0_22 = arith.constant 0 : index
    %c0_23 = arith.constant 0 : index
    %c0_24 = arith.constant 0 : index
    %51 = vector.load %arg6[%c0_22, %c0_23, %c0_24] : memref<1x128x128xf32, #tpu.memory_space<vmem>>, vector<1x128x128xf32>
    %52 = vector.shape_cast %51 : vector<1x128x128xf32> to vector<128x128xf32>
    %cst_25 = arith.constant dense<0.000000e+00> : vector<8x128xf32>
    %53 = tpu.matmul %50, %52, %cst_25 {dimension_numbers = #tpu.dot_dimension_numbers<[1], [0], [0], [1], [0, 0, 1, 1], [], []>} : vector<8x128xf32>, vector<128x128xf32>, vector<8x128xf32> -> vector<8x128xf32>
    %c0_26 = arith.constant 0 : index
    %c0_27 = arith.constant 0 : index
    %c0_28 = arith.constant 0 : index
    %54 = vector.load %arg7[%c0_26, %c0_27, %c0_28] : memref<1x1x128xf32, #tpu.memory_space<vmem>>, vector<1x1x128xf32>
    %55 = vector.shape_cast %54 : vector<1x1x128xf32> to vector<1x128xf32>
    %56 = vector.broadcast %55 : vector<1x128xf32> to vector<8x128xf32>
    %57 = arith.addf %53, %56 : vector<8x128xf32>
    %58 = arith.addf %57, %4 : vector<8x128xf32>
    %c0_29 = arith.constant 0 : index
    %c0_30 = arith.constant 0 : index
    %c0_31 = arith.constant 0 : index
    %59 = vector.load %arg8[%c0_29, %c0_30, %c0_31] : memref<1x1x128xf32, #tpu.memory_space<vmem>>, vector<1x1x128xf32>
    %60 = vector.shape_cast %59 : vector<1x1x128xf32> to vector<1x128xf32>
    %c0_32 = arith.constant 0 : index
    %c0_33 = arith.constant 0 : index
    %c0_34 = arith.constant 0 : index
    %61 = vector.load %arg9[%c0_32, %c0_33, %c0_34] : memref<1x1x128xf32, #tpu.memory_space<vmem>>, vector<1x1x128xf32>
    %62 = vector.shape_cast %61 : vector<1x1x128xf32> to vector<1x128xf32>
    %cst_35 = arith.constant dense<0.000000e+00> : vector<8xf32>
    %63 = vector.multi_reduction <add>, %58, %cst_35 [1] : vector<8x128xf32> to vector<8xf32>
    %64 = vector.shape_cast %63 : vector<8xf32> to vector<8x1xf32>
    %cst_36 = arith.constant 1.280000e+02 : f32
    %65 = vector.broadcast %cst_36 : f32 to vector<8x1xf32>
    %66 = arith.divf %64, %65 : vector<8x1xf32>
    %67 = vector.broadcast %66 : vector<8x1xf32> to vector<8x128xf32>
    %68 = arith.subf %58, %67 : vector<8x128xf32>
    %69 = arith.mulf %68, %68 : vector<8x128xf32>
    %cst_37 = arith.constant dense<0.000000e+00> : vector<8xf32>
    %70 = vector.multi_reduction <add>, %69, %cst_37 [1] : vector<8x128xf32> to vector<8xf32>
    %71 = vector.shape_cast %70 : vector<8xf32> to vector<8x1xf32>
    %cst_38 = arith.constant 1.280000e+02 : f32
    %72 = vector.broadcast %cst_38 : f32 to vector<8x1xf32>
    %73 = arith.divf %71, %72 : vector<8x1xf32>
    %74 = vector.broadcast %66 : vector<8x1xf32> to vector<8x128xf32>
    %75 = arith.subf %58, %74 : vector<8x128xf32>
    %cst_39 = arith.constant 9.99999996E-13 : f32
    %76 = vector.broadcast %cst_39 : f32 to vector<8x1xf32>
    %77 = arith.addf %73, %76 : vector<8x1xf32>
    %78 = math.rsqrt %77 : vector<8x1xf32>
    %79 = vector.broadcast %78 : vector<8x1xf32> to vector<8x128xf32>
    %80 = arith.mulf %75, %79 : vector<8x128xf32>
    %81 = vector.broadcast %60 : vector<1x128xf32> to vector<8x128xf32>
    %82 = arith.mulf %80, %81 : vector<8x128xf32>
    %83 = vector.broadcast %62 : vector<1x128xf32> to vector<8x128xf32>
    %84 = arith.addf %82, %83 : vector<8x128xf32>
    %c0_40 = arith.constant 0 : index
    %c0_41 = arith.constant 0 : index
    %c0_42 = arith.constant 0 : index
    %85 = vector.load %arg10[%c0_40, %c0_41, %c0_42] : memref<1x128x512xf32, #tpu.memory_space<vmem>>, vector<1x128x512xf32>
    %86 = vector.shape_cast %85 : vector<1x128x512xf32> to vector<128x512xf32>
    %cst_43 = arith.constant dense<0.000000e+00> : vector<8x512xf32>
    %87 = tpu.matmul %84, %86, %cst_43 {dimension_numbers = #tpu.dot_dimension_numbers<[1], [0], [0], [1], [0, 0, 1, 1], [], []>} : vector<8x128xf32>, vector<128x512xf32>, vector<8x512xf32> -> vector<8x512xf32>
    %c0_44 = arith.constant 0 : index
    %c0_45 = arith.constant 0 : index
    %c0_46 = arith.constant 0 : index
    %88 = vector.load %arg11[%c0_44, %c0_45, %c0_46] : memref<1x1x512xf32, #tpu.memory_space<vmem>>, vector<1x1x512xf32>
    %89 = vector.shape_cast %88 : vector<1x1x512xf32> to vector<1x512xf32>
    %90 = vector.broadcast %89 : vector<1x512xf32> to vector<8x512xf32>
    %91 = arith.addf %87, %90 : vector<8x512xf32>
    %cst_47 = arith.constant 5.000000e-01 : f32
    %92 = vector.broadcast %cst_47 : f32 to vector<8x512xf32>
    %93 = arith.mulf %92, %91 : vector<8x512xf32>
    %cst_48 = arith.constant 4.471500e-02 : f32
    %94 = vector.broadcast %cst_48 : f32 to vector<8x512xf32>
    %95 = arith.mulf %94, %91 : vector<8x512xf32>
    %96 = arith.mulf %95, %91 : vector<8x512xf32>
    %97 = arith.mulf %96, %91 : vector<8x512xf32>
    %98 = arith.addf %91, %97 : vector<8x512xf32>
    %cst_49 = arith.constant 0.797884583 : f32
    %99 = vector.broadcast %cst_49 : f32 to vector<8x512xf32>
    %100 = arith.mulf %99, %98 : vector<8x512xf32>
    %101 = math.tanh %100 : vector<8x512xf32>
    %cst_50 = arith.constant 1.000000e+00 : f32
    %102 = vector.broadcast %cst_50 : f32 to vector<8x512xf32>
    %103 = arith.addf %102, %101 : vector<8x512xf32>
    %104 = arith.mulf %93, %103 : vector<8x512xf32>
    %c0_51 = arith.constant 0 : index
    %c0_52 = arith.constant 0 : index
    %c0_53 = arith.constant 0 : index
    %105 = vector.load %arg12[%c0_51, %c0_52, %c0_53] : memref<1x512x128xf32, #tpu.memory_space<vmem>>, vector<1x512x128xf32>
    %106 = vector.shape_cast %105 : vector<1x512x128xf32> to vector<512x128xf32>
    %cst_54 = arith.constant dense<0.000000e+00> : vector<8x128xf32>
    %107 = tpu.matmul %104, %106, %cst_54 {dimension_numbers = #tpu.dot_dimension_numbers<[1], [0], [0], [1], [0, 0, 1, 1], [], []>} : vector<8x512xf32>, vector<512x128xf32>, vector<8x128xf32> -> vector<8x128xf32>
    %c0_55 = arith.constant 0 : index
    %c0_56 = arith.constant 0 : index
    %c0_57 = arith.constant 0 : index
    %108 = vector.load %arg13[%c0_55, %c0_56, %c0_57] : memref<1x1x128xf32, #tpu.memory_space<vmem>>, vector<1x1x128xf32>
    %109 = vector.shape_cast %108 : vector<1x1x128xf32> to vector<1x128xf32>
    %110 = vector.broadcast %109 : vector<1x128xf32> to vector<8x128xf32>
    %111 = arith.addf %107, %110 : vector<8x128xf32>
    %112 = arith.addf %111, %84 : vector<8x128xf32>
    %c0_58 = arith.constant 0 : index
    %c0_59 = arith.constant 0 : index
    %c0_60 = arith.constant 0 : index
    %113 = vector.load %arg14[%c0_58, %c0_59, %c0_60] : memref<1x1x128xf32, #tpu.memory_space<vmem>>, vector<1x1x128xf32>
    %114 = vector.shape_cast %113 : vector<1x1x128xf32> to vector<1x128xf32>
    %c0_61 = arith.constant 0 : index
    %c0_62 = arith.constant 0 : index
    %c0_63 = arith.constant 0 : index
    %115 = vector.load %arg15[%c0_61, %c0_62, %c0_63] : memref<1x1x128xf32, #tpu.memory_space<vmem>>, vector<1x1x128xf32>
    %116 = vector.shape_cast %115 : vector<1x1x128xf32> to vector<1x128xf32>
    %cst_64 = arith.constant dense<0.000000e+00> : vector<8xf32>
    %117 = vector.multi_reduction <add>, %112, %cst_64 [1] : vector<8x128xf32> to vector<8xf32>
    %118 = vector.shape_cast %117 : vector<8xf32> to vector<8x1xf32>
    %cst_65 = arith.constant 1.280000e+02 : f32
    %119 = vector.broadcast %cst_65 : f32 to vector<8x1xf32>
    %120 = arith.divf %118, %119 : vector<8x1xf32>
    %121 = vector.broadcast %120 : vector<8x1xf32> to vector<8x128xf32>
    %122 = arith.subf %112, %121 : vector<8x128xf32>
    %123 = arith.mulf %122, %122 : vector<8x128xf32>
    %cst_66 = arith.constant dense<0.000000e+00> : vector<8xf32>
    %124 = vector.multi_reduction <add>, %123, %cst_66 [1] : vector<8x128xf32> to vector<8xf32>
    %125 = vector.shape_cast %124 : vector<8xf32> to vector<8x1xf32>
    %cst_67 = arith.constant 1.280000e+02 : f32
    %126 = vector.broadcast %cst_67 : f32 to vector<8x1xf32>
    %127 = arith.divf %125, %126 : vector<8x1xf32>
    %128 = vector.broadcast %120 : vector<8x1xf32> to vector<8x128xf32>
    %129 = arith.subf %112, %128 : vector<8x128xf32>
    %cst_68 = arith.constant 9.99999996E-13 : f32
    %130 = vector.broadcast %cst_68 : f32 to vector<8x1xf32>
    %131 = arith.addf %127, %130 : vector<8x1xf32>
    %132 = math.rsqrt %131 : vector<8x1xf32>
    %133 = vector.broadcast %132 : vector<8x1xf32> to vector<8x128xf32>
    %134 = arith.mulf %129, %133 : vector<8x128xf32>
    %135 = vector.broadcast %114 : vector<1x128xf32> to vector<8x128xf32>
    %136 = arith.mulf %134, %135 : vector<8x128xf32>
    %137 = vector.broadcast %116 : vector<1x128xf32> to vector<8x128xf32>
    %138 = arith.addf %136, %137 : vector<8x128xf32>
    %c0_69 = arith.constant 0 : index
    %c0_70 = arith.constant 0 : index
    %c0_71 = arith.constant 0 : index
    %139 = vector.load %arg16[%c0_69, %c0_70, %c0_71] : memref<1x8x128xf32, #tpu.memory_space<vmem>>, vector<1x8x128xf32>
    %140 = vector.shape_cast %139 : vector<1x8x128xf32> to vector<8x128xf32>
    %141 = vector.shape_cast %138 : vector<8x128xf32> to vector<1x8x128xf32>
    tpu.vector_store %arg16[%c0_69, %c0_70, %c0_71], %141 {strides = array<i32>} : memref<1x8x128xf32, #tpu.memory_space<vmem>>, vector<1x8x128xf32>,
    return
  }
  func.func @transform_0(%arg0: i32, %arg1: i32) -> (i32, i32, i32) {
    %c0_i32 = arith.constant 0 : i32
    %c0_i32_0 = arith.constant 0 : i32
    %c0_i32_1 = arith.constant 0 : i32
    return %arg0, %c0_i32, %c0_i32_0 : i32, i32, i32
  }
  func.func @transform_1(%arg0: i32, %arg1: i32) -> (i32, i32, i32) {
    %c0_i32 = arith.constant 0 : i32
    %c0_i32_0 = arith.constant 0 : i32
    %c0_i32_1 = arith.constant 0 : i32
    return %arg0, %c0_i32, %c0_i32_0 : i32, i32, i32
  }
  func.func @transform_2(%arg0: i32, %arg1: i32) -> (i32, i32, i32) {
    %c0_i32 = arith.constant 0 : i32
    %c0_i32_0 = arith.constant 0 : i32
    %c0_i32_1 = arith.constant 0 : i32
    return %arg1, %c0_i32, %c0_i32_0 : i32, i32, i32
  }
  func.func @transform_3(%arg0: i32, %arg1: i32) -> (i32, i32, i32) {
    %c0_i32 = arith.constant 0 : i32
    %c0_i32_0 = arith.constant 0 : i32
    %c0_i32_1 = arith.constant 0 : i32
    return %arg1, %c0_i32, %c0_i32_0 : i32, i32, i32
  }
  func.func @transform_4(%arg0: i32, %arg1: i32) -> (i32, i32, i32) {
    %c0_i32 = arith.constant 0 : i32
    %c0_i32_0 = arith.constant 0 : i32
    %c0_i32_1 = arith.constant 0 : i32
    return %arg1, %c0_i32, %c0_i32_0 : i32, i32, i32
  }
  func.func @transform_5(%arg0: i32, %arg1: i32) -> (i32, i32, i32) {
    %c0_i32 = arith.constant 0 : i32
    %c0_i32_0 = arith.constant 0 : i32
    %c0_i32_1 = arith.constant 0 : i32
    return %arg1, %c0_i32, %c0_i32_0 : i32, i32, i32
  }
  func.func @transform_6(%arg0: i32, %arg1: i32) -> (i32, i32, i32) {
    %c0_i32 = arith.constant 0 : i32
    %c0_i32_0 = arith.constant 0 : i32
    %c0_i32_1 = arith.constant 0 : i32
    return %arg1, %c0_i32, %c0_i32_0 : i32, i32, i32
  }
  func.func @transform_7(%arg0: i32, %arg1: i32) -> (i32, i32, i32) {
    %c0_i32 = arith.constant 0 : i32
    %c0_i32_0 = arith.constant 0 : i32
    %c0_i32_1 = arith.constant 0 : i32
    return %arg1, %c0_i32, %c0_i32_0 : i32, i32, i32
  }
  func.func @transform_8(%arg0: i32, %arg1: i32) -> (i32, i32, i32) {
    %c0_i32 = arith.constant 0 : i32
    %c0_i32_0 = arith.constant 0 : i32
    %c0_i32_1 = arith.constant 0 : i32
    return %arg1, %c0_i32, %c0_i32_0 : i32, i32, i32
  }
  func.func @transform_9(%arg0: i32, %arg1: i32) -> (i32, i32, i32) {
    %c0_i32 = arith.constant 0 : i32
    %c0_i32_0 = arith.constant 0 : i32
    %c0_i32_1 = arith.constant 0 : i32
    return %arg1, %c0_i32, %c0_i32_0 : i32, i32, i32
  }
  func.func @transform_10(%arg0: i32, %arg1: i32) -> (i32, i32, i32) {
    %c0_i32 = arith.constant 0 : i32
    %c0_i32_0 = arith.constant 0 : i32
    %c0_i32_1 = arith.constant 0 : i32
    return %arg1, %c0_i32, %c0_i32_0 : i32, i32, i32
  }
  func.func @transform_11(%arg0: i32, %arg1: i32) -> (i32, i32, i32) {
    %c0_i32 = arith.constant 0 : i32
    %c0_i32_0 = arith.constant 0 : i32
    %c0_i32_1 = arith.constant 0 : i32
    return %arg1, %c0_i32, %c0_i32_0 : i32, i32, i32
  }
  func.func @transform_12(%arg0: i32, %arg1: i32) -> (i32, i32, i32) {
    %c0_i32 = arith.constant 0 : i32
    %c0_i32_0 = arith.constant 0 : i32
    %c0_i32_1 = arith.constant 0 : i32
    return %arg1, %c0_i32, %c0_i32_0 : i32, i32, i32
  }
  func.func @transform_13(%arg0: i32, %arg1: i32) -> (i32, i32, i32) {
    %c0_i32 = arith.constant 0 : i32
    %c0_i32_0 = arith.constant 0 : i32
    %c0_i32_1 = arith.constant 0 : i32
    return %arg1, %c0_i32, %c0_i32_0 : i32, i32, i32
  }
  func.func @transform_14(%arg0: i32, %arg1: i32) -> (i32, i32, i32) {
    %c0_i32 = arith.constant 0 : i32
    %c0_i32_0 = arith.constant 0 : i32
    %c0_i32_1 = arith.constant 0 : i32
    return %arg0, %c0_i32, %c0_i32_0 : i32, i32, i32
  }
}

module attributes {stable_mosaic.version = 11 : i64} {
  func.func @head_kernel(%arg0: memref<2x128xf32, #tpu.memory_space<vmem>>, %arg1: memref<128x128xf32, #tpu.memory_space<vmem>>, %arg2: memref<1x128xf32, #tpu.memory_space<vmem>>, %arg3: memref<2x128xf32, #tpu.memory_space<vmem>>, %arg4: memref<128x128xf32, #tpu.memory_space<vmem>>, %arg5: memref<1x128xf32, #tpu.memory_space<vmem>>, %arg6: memref<2x128xf32, #tpu.memory_space<vmem>>) attributes {dimension_semantics = [], scalar_prefetch = 0 : i64, scratch_operands = 0 : i64, tpu.core_type = #tpu.core_type<tc>} {
    %c0 = arith.constant 0 : index
    %c0_0 = arith.constant 0 : index
    %0 = vector.load %arg0[%c0, %c0_0] : memref<2x128xf32, #tpu.memory_space<vmem>>, vector<2x128xf32>
    %c0_1 = arith.constant 0 : index
    %c0_2 = arith.constant 0 : index
    %1 = vector.load %arg1[%c0_1, %c0_2] : memref<128x128xf32, #tpu.memory_space<vmem>>, vector<128x128xf32>
    %cst = arith.constant dense<0.000000e+00> : vector<2x128xf32>
    %2 = tpu.matmul %0, %1, %cst {dimension_numbers = #tpu.dot_dimension_numbers<[1], [0], [0], [1], [0, 0, 1, 1], [], []>} : vector<2x128xf32>, vector<128x128xf32>, vector<2x128xf32> -> vector<2x128xf32>
    %c0_3 = arith.constant 0 : index
    %c0_4 = arith.constant 0 : index
    %3 = vector.load %arg2[%c0_3, %c0_4] : memref<1x128xf32, #tpu.memory_space<vmem>>, vector<1x128xf32>
    %4 = vector.broadcast %3 : vector<1x128xf32> to vector<2x128xf32>
    %5 = arith.addf %2, %4 : vector<2x128xf32>
    %6 = math.tanh %5 : vector<2x128xf32>
    %c0_5 = arith.constant 0 : index
    %c0_6 = arith.constant 0 : index
    %7 = vector.load %arg3[%c0_5, %c0_6] : memref<2x128xf32, #tpu.memory_space<vmem>>, vector<2x128xf32>
    %8 = arith.mulf %6, %7 : vector<2x128xf32>
    %c0_7 = arith.constant 0 : index
    %c0_8 = arith.constant 0 : index
    %9 = vector.load %arg4[%c0_7, %c0_8] : memref<128x128xf32, #tpu.memory_space<vmem>>, vector<128x128xf32>
    %cst_9 = arith.constant dense<0.000000e+00> : vector<2x128xf32>
    %10 = tpu.matmul %8, %9, %cst_9 {dimension_numbers = #tpu.dot_dimension_numbers<[1], [0], [0], [1], [0, 0, 1, 1], [], []>} : vector<2x128xf32>, vector<128x128xf32>, vector<2x128xf32> -> vector<2x128xf32>
    %c0_10 = arith.constant 0 : index
    %c0_11 = arith.constant 0 : index
    %11 = vector.load %arg5[%c0_10, %c0_11] : memref<1x128xf32, #tpu.memory_space<vmem>>, vector<1x128xf32>
    %12 = vector.broadcast %11 : vector<1x128xf32> to vector<2x128xf32>
    %13 = arith.addf %10, %12 : vector<2x128xf32>
    %cst_12 = arith.constant 0.000000e+00 : f32
    %14 = vector.broadcast %cst_12 : f32 to vector<2x128xf32>
    %15 = arith.maximumf %13, %14 : vector<2x128xf32>
    %c0_13 = arith.constant 0 : index
    %c0_14 = arith.constant 0 : index
    %16 = vector.load %arg6[%c0_13, %c0_14] : memref<2x128xf32, #tpu.memory_space<vmem>>, vector<2x128xf32>
    tpu.vector_store %arg6[%c0_13, %c0_14], %15 {strides = array<i32>} : memref<2x128xf32, #tpu.memory_space<vmem>>, vector<2x128xf32>,
    return
  }
}

</mosaic_0001>

<bundles_post_ra>
// kernel: bert_classifier_forward.3
= control target key start
LH: loop header
LB: loop body
LE: loop exit
PB: predicated region body
PF: predicated region fallthrough
CT: control target
= control target key end

     0   :  { %s107_s0 = inlined_call_operand.vmem [shape: f32[16,128], index: 0, kind: input, shape index: {}]   ;;  %s108_s1 = inlined_call_operand.vmem [shape: f32[1,128], index: 1, kind: input, shape index: {}]   ;;  %s109_s2 = inlined_call_operand.vmem [shape: f32[1,128], index: 2, kind: input, shape index: {}]   ;;  %s110_s3 = inlined_call_operand.vmem [shape: f32[16,128], index: 3, kind: output, shape index: {}]  }
   0x1   :  { %v14_v0 = vld [vmem:[%s107_s0] sm:$0xff]  ;;  %v15_v1 = vld [vmem:[%s107_s0 + $0x8] sm:$0xff] }
   0x2   :  { %18 = vadd.xlane.f32.xlu0 %v14_v0  ;;  %v63_v17 = vld [vmem:[%s108_s1] ss:$0 sm:$0xff] }
   0x3   :  { %v64_v19 = vld [vmem:[%s109_s2] ss:$0 sm:$0xff] }
   0x6   :  { %20 = vadd.xlane.f32.xlu0 %v15_v1 }
  0x8f   :  { %v19_v2 = vpop.xlane.xlu0 %18 }
  0x90   :  { %v23_v3 = vmul.f32 0.0078125, %v19_v2 }
  0x92   :  { %v25_v4 = vsub.f32 %v14_v0, %v23_v3 }
  0x93   :  { %v21_v5 = vpop.xlane.xlu0 %20 }
  0x94   :  { %v24_v6 = vmul.f32 0.0078125, %v21_v5  ;;  %v27_v7 = vmul.f32 %v25_v4, %v25_v4 }
  0x96   :  { %v26_v8 = vsub.f32 %v15_v1, %v24_v6  ;;  %29 = vadd.xlane.f32.xlu1 %v27_v7 }
  0x98   :  { %v28_v9 = vmul.f32 %v26_v8, %v26_v8 }
  0x9a   :  { %31 = vadd.xlane.f32.xlu1 %v28_v9 }
 0x123   :  { %v30_v10 = vpop.xlane.xlu1 %29 }
 0x124   :  { %v33_v11 = vmul.f32 0.0078125, %v30_v10 }
 0x126   :  { %v35_v12 = vadd.f32 1e-12, %v33_v11 }
 0x127   :  { %v32_v13 = vpop.xlane.xlu1 %31 }
 0x128   :  { %65 = vrsqrt.f32 %v35_v12  ;;  %v34_v14 = vmul.f32 0.0078125, %v32_v13 }
 0x12a   :  { %v36_v15 = vadd.f32 1e-12, %v34_v14 }
 0x12c   :  { %67 = vrsqrt.f32 %v36_v15 }
 0x132   :  { %v66_v16 = vpop.eup %65 }
 0x133   :  { %v39_v18 = vmul.f32 %v66_v16, %v25_v4 }
 0x135   :  { %v47_v20 = vmul.f32 %v63_v17, %v39_v18 }
 0x136   :  { %v68_v21 = vpop.eup %67 }
 0x137   :  { %v55_v22 = vadd.f32 %v64_v19, %v47_v20  ;;  %v40_v23 = vmul.f32 %v68_v21, %v26_v8 }
 0x139   :  { %57 = vst [vmem:[%s110_s3] sm:$0xff] %v55_v22  ;;  %v48_v24 = vmul.f32 %v63_v17, %v40_v23 }
 0x13b   :  { %v56_v25 = vadd.f32 %v64_v19, %v48_v24 }
 0x13d   :  { %58 = vst [vmem:[%s110_s3 + $0x8] sm:$0xff] %v56_v25 }

// kernel: bert_classifier_forward.5
= control target key start
LH: loop header
LB: loop body
LE: loop exit
PB: predicated region body
PF: predicated region fallthrough
CT: control target
= control target key end

     0   :  { %v414_v3 = vmov 0.0|0.0   ;;  %vm415_vm0 = vmmov 0   ;;  %v416_v6 = vmov 0.0   ;;  %s589_s0 = inlined_call_operand.vmem [shape: f32[2,128], index: 0, kind: input, shape index: {}]   ;;  %s590_s1 = inlined_call_operand.vmem [shape: f32[128,128], index: 1, kind: input, shape index: {}]   ;;  %s591_s2 = inlined_call_operand.vmem [shape: f32[1,128], index: 2, kind: input, shape index: {}]   ;;  %s592_s3 = inlined_call_operand.vmem [shape: f32[2,128], index: 3, kind: input, shape index: {}]   ;;  %s593_s4 = inlined_call_operand.vmem [shape: f32[128,128], index: 4, kind: input, shape index: {}]   ;;  %s594_s5 = inlined_call_operand.vmem [shape: f32[1,128], index: 5, kind: input, shape index: {}]   ;;  %s595_s6 = inlined_call_operand.hbm [shape: f32[2,128], index: 6, kind: output, shape index: {}]  }
   0x1   :  { %v25_v0 = vld [vmem:[%s590_s1] sm:$0xff]  ;;  %v26_v1 = vld [vmem:[%s590_s1 + $0x8] sm:$0xff]  ;;  %v27_v2 = vld [vmem:[%s590_s1 + $0x10] sm:$0xff]  ;;  %336 = vmatprep.subr.bf16.mxu0 %v414_v3  ;;  %298 = vmatprep.mubr.msk.f32.mxu0 %vm415_vm0, %v416_v6 }
   0x2   :  { %v337_v4 = vpack.c.bf16 %v26_v1, %v25_v0  ;;  %v28_v5 = vld [vmem:[%s590_s1 + $0x18] sm:$0xff]  ;;  %360 = vmatprep.subr.bf16.mxu1 %v414_v3  ;;  %333 = vmatprep.mubr.msk.f32.mxu1 %vm415_vm0, %v416_v6  ;;  %v29_v8 = vld [vmem:[%s590_s1 + $0x20] sm:$0xff]  ;;  %v30_v9 = vld [vmem:[%s590_s1 + $0x28] sm:$0xff] }
   0x3   :  { %v340_v7 = vpack.c.bf16 %v28_v5, %v27_v2  ;;  %v121_v10 = vld [vmem:[%s593_s4] sm:$0xff]  ;;  %v122_v11 = vld [vmem:[%s593_s4 + $0x8] sm:$0xff]  ;;  %v123_v12 = vld [vmem:[%s593_s4 + $0x10] sm:$0xff]  ;;  %v343_v14 = vpack.c.bf16 %v30_v9, %v29_v8 }
   0x4   :  { %338 = vmatpush3.bf16.msra.mxu0 %v337_v4  ;;  %v124_v13 = vld [vmem:[%s593_s4 + $0x18] sm:$0xff]  ;;  %v361_v15 = vpack.c.bf16 %v122_v11, %v121_v10  ;;  %v31_v16 = vld [vmem:[%s590_s1 + $0x30] sm:$0xff] }
   0x5   :  { %339 = vmatprep.subr.bf16.mxu0 %v414_v3  ;;  %v32_v17 = vld [vmem:[%s590_s1 + $0x38] sm:$0xff] }
   0x8   :  { %341 = vmatpush3.bf16.msra.mxu0 %v340_v7 }
   0x9   :  { %342 = vmatprep.subr.bf16.mxu0 %v414_v3 }
   0xa   :  { %11 = vsyncpa [#allocation3], 0  ;;  %362 = vmatpush3.bf16.msra.mxu1 %v361_v15  ;;  %v364_v18 = vpack.c.bf16 %v124_v13, %v123_v12  ;;  %v125_v19 = vld [vmem:[%s593_s4 + $0x20] sm:$0xff]  ;;  %v126_v20 = vld [vmem:[%s593_s4 + $0x28] sm:$0xff]  ;;  %v346_v21 = vpack.c.bf16 %v32_v17, %v31_v16  ;;  %s417_s18 = smov [#allocation2]  }
   0xb   :  { %363 = vmatprep.subr.bf16.mxu1 %v414_v3  ;;  %v33_v22 = vld [vmem:[%s590_s1 + $0x40] sm:$0xff]  ;;  %v34_v23 = vld [vmem:[%s590_s1 + $0x48] sm:$0xff]  ;;  %v367_v24 = vpack.c.bf16 %v126_v20, %v125_v19  ;;  %v127_v25 = vld [vmem:[%s593_s4 + $0x30] sm:$0xff]  ;;  %s222_s19 = sshll.u32 %s417_s18, 4  ;;  %s223_s19 = int_to_ptr.vmem [resolvable:$true] %s222_s19 }
   0xc   :  { %344 = vmatpush3.bf16.msra.mxu0 %v343_v14  ;;  %v128_v26 = vld [vmem:[%s593_s4 + $0x38] sm:$0xff]  ;;  %v349_v27 = vpack.c.bf16 %v34_v23, %v33_v22  ;;  %v35_v28 = vld [vmem:[%s590_s1 + $0x50] sm:$0xff]  ;;  %v37_v32 = vld [vmem:[%s590_s1 + $0x60] sm:$0xff]  ;;  %p395_p1 = scmp.lt.s32.totalorder %s223_s19, %s223_s19 }
   0xd   :  { %345 = vmatprep.subr.bf16.mxu0 %v414_v3  ;;  %v36_v29 = vld [vmem:[%s590_s1 + $0x58] sm:$0xff]  ;;  %v370_v30 = vpack.c.bf16 %v128_v26, %v127_v25  ;;  %v38_v33 = vld [vmem:[%s590_s1 + $0x68] sm:$0xff]  ;;  %v39_v35 = vld [vmem:[%s590_s1 + $0x70] sm:$0xff] }
   0xe   :  { %365 = vmatpush3.bf16.msra.mxu1 %v364_v18  ;;  %v352_v31 = vpack.c.bf16 %v36_v29, %v35_v28  ;;  %v355_v34 = vpack.c.bf16 %v38_v33, %v37_v32  ;;  %v40_v36 = vld [vmem:[%s590_s1 + $0x78] sm:$0xff]  ;;  %v24_v38 = vld [vmem:[%s589_s0] sm:$0x3]  ;;  %v130_v40 = vld [vmem:[%s593_s4 + $0x48] sm:$0xff] }
   0xf   :  { %366 = vmatprep.subr.bf16.mxu1 %v414_v3  ;;  %v358_v37 = vpack.c.bf16 %v40_v36, %v39_v35  ;;  %v129_v39 = vld [vmem:[%s593_s4 + $0x40] sm:$0xff]  ;;  %v131_v42 = vld [vmem:[%s593_s4 + $0x50] sm:$0xff]  ;;  %v132_v43 = vld [vmem:[%s593_s4 + $0x58] sm:$0xff] }
  0x10   :  { %347 = vmatpush3.bf16.msra.mxu0 %v346_v21  ;;  %v373_v41 = vpack.c.bf16 %v130_v40, %v129_v39  ;;  %v376_v44 = vpack.c.bf16 %v132_v43, %v131_v42  ;;  %v133_v45 = vld [vmem:[%s593_s4 + $0x60] sm:$0xff]  ;;  %v134_v46 = vld [vmem:[%s593_s4 + $0x68] sm:$0xff]  ;;  %v135_v48 = vld [vmem:[%s593_s4 + $0x70] sm:$0xff] }
  0x11   :  { %348 = vmatprep.subr.bf16.mxu0 %v414_v3  ;;  %v379_v47 = vpack.c.bf16 %v134_v46, %v133_v45  ;;  %v136_v49 = vld [vmem:[%s593_s4 + $0x78] sm:$0xff]  ;;  %v230_v51 = vld [vmem:[%s591_s2] ss:$0 sm:$0xff]  ;;  %s390_s2 = scalar_lea.vmem %s223_s19, 32 }
  0x12   :  { %368 = vmatpush3.bf16.msra.mxu1 %v367_v24  ;;  %v382_v50 = vpack.c.bf16 %v136_v49, %v135_v48  ;;  %v119_v55 = vld [vmem:[%s592_s3] sm:$0x3]  ;;  %p391_p0 = scmp.ne.s32.totalorder %s223_s19, %s390_s2  ;;  %p396_p2 = scmp.lt.s32.totalorder %s390_s2, %s390_s2 }
  0x13   :  { %369 = vmatprep.subr.bf16.mxu1 %v414_v3  ;;  %v231_v58 = vld [vmem:[%s594_s5] ss:$0 sm:$0xff] }
  0x14   :  { %350 = vmatpush3.bf16.msra.mxu0 %v349_v27  ;;  %p397_p3 = por %p396_p2, %p395_p1 }
  0x15   :  { %351 = vmatprep.subr.bf16.mxu0 %v414_v3 }
  0x16   :  { %371 = vmatpush3.bf16.msra.mxu1 %v370_v30  ;;  %p398_p4 = pnand %p397_p3, %p391_p0 }
  0x17   :  { %372 = vmatprep.subr.bf16.mxu1 %v414_v3 }
  0x18   :  { %353 = vmatpush3.bf16.msra.mxu0 %v352_v31 }
  0x19   :  { %354 = vmatprep.subr.bf16.mxu0 %v414_v3 }
  0x1a   :  { %374 = vmatpush3.bf16.msra.mxu1 %v373_v41 }
  0x1b   :  { %375 = vmatprep.subr.bf16.mxu1 %v414_v3 }
  0x1c   :  { %356 = vmatpush3.bf16.msra.mxu0 %v355_v34 }
  0x1d   :  { %357 = vmatprep.subr.bf16.mxu0 %v414_v3 }
  0x1e   :  { %377 = vmatpush3.bf16.msra.mxu1 %v376_v44 }
  0x1f   :  { %378 = vmatprep.subr.bf16.mxu1 %v414_v3 }
  0x20   :  { %359 = vmatpush3.bf16.msra.mxu0 %v358_v37 }
  0x22   :  { %380 = vmatpush3.bf16.msra.mxu1 %v379_v47 }
  0x23   :  { %299 = vmatmul.mubr.f32.vlgmr.msra.gmra.mrb[0].mxu0 %v24_v38  ;;  %381 = vmatprep.subr.bf16.mxu1 %v414_v3 }
  0x26   :  { %383 = vmatpush3.bf16.msra.mxu1 %v382_v50 }
  0xf6   :  { %v114_v52 = vpop.f32.mrb[0].mxu0 }
  0xf7   :  { %v115_v53 = vadd.f32 %v230_v51, %v114_v52  ;;  %v300_v54 = vpop.f32.mrb[1].mxu0 }
  0xf9   :  { %388 = vtanh.f32 %v115_v53 }
 0x103   :  { %v389_v56 = vpop.eup %388 }
 0x104   :  { %v120_v57 = vmul.f32 %v389_v56, %v119_v55 }
 0x106   :  { %334 = vmatmul.mubr.f32.vlgmr.msra.gmra.mrb[0].mxu1 %v120_v57 }
 0x1d9   :  { %v210_v59 = vpop.f32.mrb[0].mxu1 }
 0x1da   :  { %v211_v60 = vadd.f32 %v231_v58, %v210_v59  ;;  %v335_v61 = vpop.f32.mrb[1].mxu1 }
 0x1dc   :  { %v214_v62 = vmax.f32 %v211_v60, 0.0 }
 0x1de   :  { %215 = vst [vmem:[#allocation2] sm:$0x3] %v214_v62 }
 0x1df   :  { %401 = shalt.err (!%p398_p4)
}
 0x1e0   :  { %s402_s21 = scalar_lea.hbm %s595_s6, 32 }
 0x1e1   :  { %p403_p5 = scmp.ne.s32.totalorder %s595_s6, %s402_s21  ;;  %p406_p6 = scmp.lt.u32.totalorder %s402_s21, %s595_s6 }
 0x1e3   :  { %p408_p7 = pnand %p406_p6, %p403_p5 }
 0x1e5   :  { %411 = shalt.err (!%p408_p7)
}
 0x1e6   :  { %225 = dma.vmem_to_hbm [thread:$0]  %s223_s19, 32, %s595_s6, [#allocation3]  }
 0x1e7   :  { %412 = dma.done.wait [#allocation3], 32  }
 0x1e8   :  { %413 = vsyncadd [#allocation3], 4294967264 }
 0x1e9   :  { %229 = vsyncpa [#allocation3], 1 }

// kernel: bert_classifier_forward.4
= control target key start
LH: loop header
LB: loop body
LE: loop exit
PB: predicated region body
PF: predicated region fallthrough
CT: control target
= control target key end

     0   :  { %s3586_s0 = inlined_call_operand.vmem [shape: f32[2,8,128], index: 0, kind: input, shape index: {}]   ;;  %s3587_s1 = inlined_call_operand.vmem [shape: f32[2,1,8], index: 1, kind: input, shape index: {}]   ;;  %s3588_s2 = inlined_call_operand.hbm [shape: f32[2,128,384], index: 2, kind: input, shape index: {}]   ;;  %s3589_s3 = inlined_call_operand.vmem [shape: f32[2,1,384], index: 3, kind: input, shape index: {}]   ;;  %s3590_s4 = inlined_call_operand.vmem [shape: f32[2,128,128], index: 4, kind: input, shape index: {}]   ;;  %s3591_s5 = inlined_call_operand.vmem [shape: f32[2,1,128], index: 5, kind: input, shape index: {}]   ;;  %s3592_s6 = inlined_call_operand.vmem [shape: f32[2,1,128], index: 6, kind: input, shape index: {}]   ;;  %s3593_s7 = inlined_call_operand.vmem [shape: f32[2,1,128], index: 7, kind: input, shape index: {}]   ;;  %s3594_s8 = inlined_call_operand.hbm [shape: f32[2,128,512], index: 8, kind: input, shape index: {}]   ;;  %s3595_s9 = inlined_call_operand.vmem [shape: f32[2,1,512], index: 9, kind: input, shape index: {}]   ;;  %s3596_s10 = inlined_call_operand.hbm [shape: f32[2,512,128], index: 10, kind: input, shape index: {}]   ;;  %s3597_s11 = inlined_call_operand.vmem [shape: f32[2,1,128], index: 11, kind: input, shape index: {}]   ;;  %s3598_s12 = inlined_call_operand.vmem [shape: f32[2,1,128], index: 12, kind: input, shape index: {}]   ;;  %s3599_s13 = inlined_call_operand.vmem [shape: f32[2,1,128], index: 13, kind: input, shape index: {}]   ;;  %s3600_s14 = inlined_call_operand.vmem [shape: f32[2,8,128], index: 14, kind: output, shape index: {}]  }
   0x1   :  { %3612 = sst [smem:[#allocation18_spill]] %s3586_s0 }
   0x2   :  { %3613 = sst [smem:[#allocation19_spill]] %s3588_s2 }
   0x3   :  { %3614 = sst [smem:[#allocation20_spill]] %s3589_s3 }
   0x4   :  { %3615 = sst [smem:[#allocation21_spill]] %s3590_s4 }
   0x5   :  { %3616 = sst [smem:[#allocation22_spill]] %s3591_s5 }
   0x6   :  { %3617 = sst [smem:[#allocation23_spill]] %s3592_s6 }
   0x7   :  { %3618 = sst [smem:[#allocation24_spill]] %s3593_s7 }
   0x8   :  { %3619 = sst [smem:[#allocation25_spill]] %s3594_s8 }
   0x9   :  { %3620 = sst [smem:[#allocation26_spill]] %s3595_s9 }
   0xa   :  { %3621 = sst [smem:[#allocation27_spill]] %s3596_s10 }
   0xb   :  { %3622 = sst [smem:[#allocation28_spill]] %s3597_s11 }
   0xc   :  { %3623 = sst [smem:[#allocation29_spill]] %s3598_s12 }
   0xd   :  { %3624 = sst [smem:[#allocation30_spill]] %s3599_s13 }
   0xe   :  { %3625 = sst [smem:[#allocation31_spill]] %s3600_s14 }
   0xf   :  { %19 = vsyncpa [#allocation3], 0 }
  0x10   :  { %21 = vsyncpa [#allocation3 + $0x1], 0 }
  0x11   :  { %22 = vsyncpa [#allocation5], 0 }
  0x12   :  { %24 = vsyncpa [#allocation5 + $0x1], 0  ;;  %s2970_s29 = smov 0   ;;  %s2972_s30 = smov 0  }
  0x13   :  { %s2974_s15 = smov 0   ;;  %s2976_s16 = smov 0  }
  0x14   :  { %s2978_s17 = smov 0   ;;  %s2980_s18 = smov 0  }
  0x15   :  { %s2982_s19 = smov 0   ;;  %s2984_s20 = smov 0  }
  0x16 LB: > { %3626 = sst [smem:[#allocation9_spill]] %s2856_s30  ;;  %s3602_s21 = sadd.s32 4294967295, %s2880_s20   ;;  %s2880_s20 = sphi %s2984_s20, %s30_s20   ;;  %s2876_s19 = sphi %s2982_s19, %s3676_s19   ;;  %s2872_s18 = sphi %s2980_s18, %s3675_s18   ;;  %s2868_s17 = sphi %s2978_s17, %s3674_s17   ;;  %s2864_s16 = sphi %s2976_s16, %s3673_s16   ;;  %s2860_s15 = sphi %s2974_s15, %s3672_s15   ;;  %s2856_s30 = sphi %s2972_s30, %s3671_s30   ;;  %s2852_s29 = sphi %s2970_s29, %s3670_s29  }
  0x17   : > { %3627 = sst [smem:[#allocation10_spill]] %s2860_s15  ;;  %s39_s22 = sadd.s32 1, %s2872_s18 }
  0x18   : > { %3628 = sst [smem:[#allocation11_spill]] %s2872_s18  ;;  %p40_p0 = scmp.ge.s32.totalorder %s39_s22, 2 }
  0x19   : > { %3629 = sst [smem:[#allocation12_spill]] %s2876_s19  ;;  %s42_s23 = sadd.s32 1, %s2876_s19 }
  0x1a   : > { %3630 = sst [smem:[#allocation13_spill]] %s2880_s20  ;;  %s101_s24 = sadd.s32 1, %s2860_s15 }
  0x1b   : > { %p108_p1 = scmp.ne.s32.totalorder %s2860_s15, %s2856_s30  ;;  %s3678_s22 = smov (%p40_p0, %s39_s22), 0 }
  0x1c   : > { %3631 = sst [smem:[#allocation14_spill]] %s3678_s22  ;;  %s3680_s23 = smov (!%p40_p0, %s42_s23), %s2876_s19 }
  0x1d   : > { %s98_s25 = ssub.s32 %s2872_s18, %s3678_s22  ;;  %p109_p2 = scmp.eq.s32.totalorder %s2880_s20, 0 }
  0x1e   : > { %p44_p3 = scmp.ge.s32.totalorder %s3680_s23, 2  ;;  %p99_p4 = scmp.eq.s32.totalorder %s98_s25, 0 }
  0x1f   : > { %p110_p5 = por %p109_p2, %p108_p1  ;;  %p114_p6 = scmp.ne.s32.totalorder %s2856_s30, %s2852_s29 }
  0x20   : > { %s3682_s23 = smov (%p44_p3, %s3680_s23), 0  ;;  %p115_p7 = scmp.eq.s32.totalorder %s3602_s21, 0 }
  0x21   : > { %3632 = sst [smem:[#allocation15_spill]] %s3682_s23  ;;  %p2625_p8 = scmp.lt.s32.totalorder %s2880_s20, 4 }
  0x22   : > { %s3024_s26 = scalar_select %p99_p4, %s2860_s15, %s101_s24  }
  0x23   : > { %s3030_s27 = sand.u32 1, %s2860_s15   ;;  %p3032_p9 = por %p115_p7, %p114_p6 }
  0x24   : > { %3633 = sst [smem:[#allocation16_spill]] %s3024_s26  ;;  %s517_s22 = sand.u32 1, %s2880_s20  }
  0x25   : > { %s3634_s28 = scalar_select %p3032_p9, 1, 0 }
  0x26   : > { %p3037_p10 = pnand %p2625_p8, %p110_p5  ;;  %s3605_s29 = sshll.u32 %s3030_s27, 9 }
  0x27   : > { %s3606_s24 = sshll.u32 %s2872_s18, 13  ;;  %s3636_s8 = sld [smem:[#allocation25_spill]] }
  0x28   : > { %s521_s26 = scalar_lea.vmem [#allocation4], %s3605_s29  ;;  %s3054_s14 = scalar_lea.sflag [#allocation5], %s517_s22 }
  0x29   : > { %s528_s15 = sshll.u32 %s521_s26, 4  ;;  %p3060_p12 = pneg %p3037_p10  ;;  %s3052_s15 = int_to_ptr.vmem [resolvable:$true] %s528_s15 }
  0x2d   : > { %s3048_s19 = scalar_lea.hbm %s3636_s8, %s3606_s24  ;;  %s2725_s29 = scalar_lea.hbm %s3636_s8, 16384 }
  0x2e   : > { %s2720_s13 = scalar_lea.hbm %s3048_s19, 8192  ;;  %p2726_p1 = scmp.lt.u32.totalorder %s3048_s19, %s3636_s8 }
  0x2f   : > { %p2721_p11 = scmp.ne.s32.totalorder %s3048_s19, %s2720_s13  ;;  %p2727_p2 = scmp.lt.u32.totalorder %s2725_s29, %s2720_s13 }
  0x30   : > { %p2729_p4 = scmp.lt.u32.totalorder %s2720_s13, %s3048_s19 }
  0x31   : > { %p2723_p13 = pnand %p3060_p12, %p2721_p11  ;;  %p2728_p3 = por %p2727_p2, %p2726_p1 }
  0x33   : > { %p2724_p0 = pneg %p2723_p13  ;;  %p2730_p5 = por %p2729_p4, %p2728_p3 }
  0x35   : > { %p2731_p6 = pnand %p2730_p5, %p2724_p0 }
  0x37   : > { %2734 = shalt.err (!%p2731_p6)
}
  0x38   : > { %s2735_s22 = scalar_lea.vmem %s3052_s15, 8192  ;;  %s2882_s21 = smov [#allocation4]  }
  0x39   : > { %p2736_p7 = scmp.ne.s32.totalorder %s3052_s15, %s2735_s22  ;;  %s2740_s23 = sshll.u32 %s2882_s21, 4  ;;  %s2741_s23 = int_to_ptr.vmem [resolvable:$false] %s2740_s23 }
  0x3a   : > { %s2742_s24 = scalar_lea.vmem %s2741_s23, 16384  ;;  %p2743_p13 = scmp.lt.s32.totalorder %s3052_s15, %s2741_s23 }
  0x3b   : > { %p2738_p8 = pnand %p2736_p7, %p3060_p12  ;;  %p2744_p9 = scmp.lt.s32.totalorder %s2742_s24, %s2735_s22 }
  0x3d   : > { %p2739_p11 = pneg %p2738_p8  ;;  %p2745_p1 = por %p2744_p9, %p2743_p13 }
  0x3f   : > { %p2746_p2 = pnand %p2745_p1, %p2739_p11 }
  0x41   : > { %2749 = shalt.err (!%p2746_p2)
}
  0x42   : > { %s2883_s13 = smov 512   ;;  %s2884_s29 = smov 32  }
  0x43   : > { %2621 = dma.hbm_to_vmem [thread:$0]  (!%p3037_p10), %s3048_s19, 8192, %s3052_s15, %s3054_s14, %s2883_s13, %s2883_s13, %s2884_s29  }
  0x44   : > { %s3638_s26 = sshll.u32 %s2872_s18, 13  ;;  %s3639_s10 = sld [smem:[#allocation27_spill]] }
  0x45   : > { %s3640_s24 = sshll.u32 %s3030_s27, 9  ;;  %p2168_p9 = scmp.ge.s32.totalorder %s2880_s20, 1 }
  0x46   : > { %s549_s8 = scalar_lea.vmem [#allocation6], %s3640_s24  ;;  %p582_p0 = scmp.lt.s32.totalorder %s2880_s20, 5 }
  0x47   : > { %s556_s9 = sshll.u32 %s549_s8, 4  ;;  %s2605_s7 = smul.u32 384, %s3030_s27  ;;  %s3093_s9 = int_to_ptr.vmem [resolvable:$true] %s556_s9 }
  0x48   : > { %p3097_p3 = pnand %p2168_p9, %p582_p0  ;;  %s2606_s15 = smul.u32 6144, %s2872_s18 }
  0x49   : > { %s3642_s2 = sld [smem:[#allocation19_spill]]  ;;  %s467_s8 = scalar_lea.vmem [#allocation2], %s2605_s7 }
  0x4a   : > { %s3089_s23 = scalar_lea.hbm %s3639_s10, %s3638_s26  ;;  %s474_s26 = sshll.u32 %s467_s8, 4  ;;  %s3108_s26 = int_to_ptr.vmem [resolvable:$true] %s474_s26 }
  0x4b   : > { %s3641_s11 = scalar_select %p3097_p3, 1, 0 }
  0x4c   : > { %s464_s22 = scalar_lea.sflag [#allocation3], %s3030_s27 }
  0x4f   : > { %s3106_s29 = scalar_lea.hbm %s3642_s2, %s2606_s15  ;;  %s2755_s19 = scalar_lea.hbm %s3642_s2, 12288 }
  0x50   : > { %s2750_s21 = scalar_lea.hbm %s3106_s29, 6144  ;;  %p2756_p7 = scmp.lt.u32.totalorder %s3106_s29, %s3642_s2 }
  0x51   : > { %p2751_p4 = scmp.ne.s32.totalorder %s3106_s29, %s2750_s21  ;;  %p2757_p8 = scmp.lt.u32.totalorder %s2755_s19, %s2750_s21 }
  0x52   : > { %p2759_p13 = scmp.lt.u32.totalorder %s2750_s21, %s3106_s29 }
  0x53   : > { %p2753_p5 = pnand %p2751_p4, %p3060_p12  ;;  %p2758_p11 = por %p2757_p8, %p2756_p7 }
  0x55   : > { %p2754_p6 = pneg %p2753_p5  ;;  %p2760_p1 = por %p2759_p13, %p2758_p11 }
  0x57   : > { %p2761_p2 = pnand %p2760_p1, %p2754_p6 }
  0x59   : > { %2764 = shalt.err (!%p2761_p2)
}
  0x5a   : > { %s2765_s7 = scalar_lea.vmem %s3108_s26, 6144  ;;  %s2885_s18 = smov [#allocation2]  }
  0x5b   : > { %p2766_p9 = scmp.ne.s32.totalorder %s3108_s26, %s2765_s7  ;;  %s2770_s8 = sshll.u32 %s2885_s18, 4  ;;  %s2771_s8 = int_to_ptr.vmem [resolvable:$false] %s2770_s8 }
  0x5c   : > { %s2772_s24 = scalar_lea.vmem %s2771_s8, 12288  ;;  %p2773_p5 = scmp.lt.s32.totalorder %s3108_s26, %s2771_s8 }
  0x5d   : > { %p2768_p0 = pnand %p2766_p9, %p3060_p12  ;;  %p2774_p3 = scmp.lt.s32.totalorder %s2772_s24, %s2765_s7 }
  0x5f   : > { %p2769_p4 = pneg %p2768_p0  ;;  %p2775_p7 = por %p2774_p3, %p2773_p5 }
  0x61   : > { %p2776_p8 = pnand %p2775_p7, %p2769_p4 }
  0x63   : > { %2779 = shalt.err (!%p2776_p8)
}
  0x64   : > { %s2886_s21 = smov 384   ;;  %s2887_s19 = smov 24  }
  0x65   : > { %2618 = dma.hbm_to_vmem [thread:$0]  (!%p3037_p10), %s3106_s29, 6144, %s3108_s26, %s464_s22, %s2886_s21, %s2886_s21, %s2887_s19  }
  0x66   : > { %s2780_s15 = scalar_lea.hbm %s3089_s23, 8192  ;;  %s2785_s18 = scalar_lea.hbm %s3639_s10, 16384 }
  0x67   : > { %p2781_p6 = scmp.ne.s32.totalorder %s3089_s23, %s2780_s15  ;;  %p2786_p13 = scmp.lt.u32.totalorder %s3089_s23, %s3639_s10 }
  0x68   : > { %p2787_p1 = scmp.lt.u32.totalorder %s2785_s18, %s2780_s15  ;;  %p2789_p9 = scmp.lt.u32.totalorder %s2780_s15, %s3089_s23 }
  0x69   : > { %p2783_p3 = pnand %p2781_p6, %p3060_p12 }
  0x6a   : > { %p2788_p2 = por %p2787_p1, %p2786_p13 }
  0x6b   : > { %p2784_p11 = pneg %p2783_p3 }
  0x6c   : > { %p2790_p0 = por %p2789_p9, %p2788_p2 }
  0x6e   : > { %p2791_p4 = pnand %p2790_p0, %p2784_p11 }
  0x70   : > { %2794 = shalt.err (!%p2791_p4)
}
  0x71   : > { %s2795_s27 = scalar_lea.vmem %s3093_s9, 8192  ;;  %s2888_s29 = smov [#allocation6]  }
  0x72   : > { %p2796_p5 = scmp.ne.s32.totalorder %s3093_s9, %s2795_s27  ;;  %s2800_s26 = sshll.u32 %s2888_s29, 4  ;;  %s2801_s26 = int_to_ptr.vmem [resolvable:$false] %s2800_s26 }
  0x73   : > { %s2802_s22 = scalar_lea.vmem %s2801_s26, 16384  ;;  %p2803_p6 = scmp.lt.s32.totalorder %s3093_s9, %s2801_s26 }
  0x74   : > { %p2798_p7 = pnand %p2796_p5, %p3060_p12  ;;  %p2804_p3 = scmp.lt.s32.totalorder %s2802_s22, %s2795_s27 }
  0x76   : > { %p2799_p8 = pneg %p2798_p7  ;;  %p2805_p13 = por %p2804_p3, %p2803_p6 }
  0x78   : > { %p2806_p1 = pnand %p2805_p13, %p2799_p8 }
  0x7a   : > { %2809 = shalt.err (!%p2806_p1)
}
  0x7b   : > { %s2889_s21 = smov 128   ;;  %s2890_s19 = smov 8  }
  0x7c   : > { %2624 = dma.hbm_to_vmem [thread:$0]  (!%p3037_p10), %s3089_s23, 8192, %s3093_s9, %s3054_s14, %s2889_s21, %s2889_s21, %s2890_s19  }
  0x7d   : > { %p3643_p12 = scmp.ne.s32.totalorder %s3641_s11, 0 }
  0x7f   : > { %586 = sbr.rel (%p3643_p12) target bundleno = 3109 (0xc25), region = 76 }
  0x86   : > { %s3159_s12 = sand.u32 1, %s2856_s30   ;;  %p3644_p11 = scmp.ne.s32.totalorder %s3634_s28, 0 }
  0x87   : > { %s2607_s15 = smul.u32 384, %s3159_s12  ;;  %s589_s13 = scalar_lea.sflag [#allocation3], %s3159_s12 }
  0x89   : > { %s3163_s7 = scalar_lea.vmem [#allocation2], %s2607_s15 }
  0x8a   : > { %2843 = dma.done.wait (%p3644_p11), %s589_s13, 6144  }
  0x8b   : > { %2845 = vsyncadd (%p3644_p11), %s589_s13, 4294961152  ;;  %s3645_s9 = sadd.s32 4294967295, %s2880_s20   ;;  %s2169_s14 = sshll.u32 %s3159_s12, 9 }
  0x8c   : > { %s597_s11 = sand.u32 1, %s3645_s9   ;;  %s3172_s23 = scalar_lea.vmem [#allocation4], %s2169_s14 }
  0x8d   : > { %s598_s25 = scalar_lea.sflag [#allocation5], %s597_s11  ;;  %3646 = sst [smem:[#allocation17_spill]] %s3172_s23 }
  0x8e   : > { %2847 = dma.done.wait (%p3644_p11), %s598_s25, 16384  }
  0x8f   : > { %2849 = vsyncadd (%p3644_p11), %s598_s25, 4294950912  ;;  %p702_p10 = scmp.lt.s32.totalorder %s2868_s17, 1  ;;  %p709_p2 = scmp.lt.s32.totalorder %s2864_s16, 1 }
  0x90   : > { %s3647_s0 = sld [smem:[#allocation18_spill]]  ;;  %s3649_s3 = sld [smem:[#allocation20_spill]] }
  0x91   : > { %s3684_s17 = smov (!%p702_p10, %s2868_s17), 1  ;;  %s3650_s4 = sld [smem:[#allocation21_spill]] }
  0x92   : > { %s3184_s18 = scalar_select %p709_p2, %s2864_s16, 1 }
  0x93   : > { %s2171_s28 = sshll.u32 %s3684_s17, 3  ;;  %s3653_s5 = sld [smem:[#allocation28_spill]] }
  0x94   : > { %s2608_s21 = smul.u32 3, %s3184_s18  ;;  %s2194_s19 = sshll.u32 %s3184_s18, 7 }
  0x95   : > { %s2174_s12 = sshll.u32 %s3184_s18, 2  ;;  %s3656_s29 = sld [smem:[#allocation30_spill]] }
  0x96   : > { %s705_s22 = scalar_lea.vmem %s3647_s0, %s2171_s28  ;;  %s3203_s25 = scalar_lea.vmem %s3649_s3, %s2608_s21 }
  0x97   : > { %s3208_s8 = scalar_lea.vmem %s3650_s4, %s2194_s19  ;;  %s3654_s3 = sld [smem:[#allocation26_spill]] }
  0x98   : > { %s3655_s19 = sld [smem:[#allocation29_spill]]  ;;  %s3657_s26 = sld [smem:[#allocation31_spill]] }
  0x99   : > { %s733_s9 = scalar_lea.vmem %s3653_s5, %s3184_s18  ;;  %s3241_s13 = scalar_lea.vmem [#allocation6], %s2169_s14 }
  0x9a   : > { %p2176_p9 = scmp.ne.s32.totalorder %s2864_s16, 0 }
  0x9b   : > { %s739_s6 = scalar_lea.vmem %s3656_s29, %s3184_s18  ;;  %v748_v0 = vld [vmem:[%s705_s22] sm:$0xff] (!%p2176_p9) }
  0x9c   : > { %747 = sbr.rel (%p2176_p9) target bundleno = 163 (0xa3), region = 92 }
  0x9d   : > { %s3226_s23 = scalar_lea.vmem %s3654_s3, %s2174_s12 }
  0x9e   : > { %s736_s4 = scalar_lea.vmem %s3655_s19, %s3184_s18  ;;  %s3239_s20 = scalar_lea.vmem %s3657_s26, %s2171_s28 }
  0x9f   : > { %749 = vst [vmem:[%s3239_s20] sm:$0xff] (!%p2176_p9), %v748_v0 }
  0xa3 PF: > { %v753_v1 = vld [vmem:[%s3163_s7 + $0x8] sm:$0xff]  ;;  %v756_v2 = vld [vmem:[%s3163_s7 + $0x20] sm:$0xff]  ;;  %v755_v5 = vld [vmem:[%s3163_s7 + $0x18] sm:$0xff]  ;;  %v2891_v8 = vmov 0.0   ;;  %v2892_v9 = vmov 0.0|0.0   ;;  %vm2893_vm0 = vmmov 0  }
  0xa4   : > { %v752_v3 = vld [vmem:[%s3163_s7] sm:$0xff]  ;;  %v2397_v4 = vpack.c.bf16 %v756_v2, %v753_v1  ;;  %v759_v6 = vld [vmem:[%s3163_s7 + $0x38] sm:$0xff]  ;;  %v762_v7 = vld [vmem:[%s3163_s7 + $0x50] sm:$0xff]  ;;  %881 = vmatprep.mubr.f32.mxu0 %v2891_v8  ;;  %2429 = vmatprep.subr.bf16.mxu1 %v2892_v9  ;;  %vm958_vm1 = vcmask 523264   ;;  %s2894_s3 = smov 64   ;;  %vm1043_vm2 = vcmask 64512  }
  0xa5   : > { %v2399_v10 = vpack.c.bf16 %v755_v5, %v752_v3  ;;  %v2401_v11 = vpack.c.bf16 %v762_v7, %v759_v6  ;;  %v758_v12 = vld [vmem:[%s3163_s7 + $0x30] sm:$0xff]  ;;  %v761_v13 = vld [vmem:[%s3163_s7 + $0x48] sm:$0xff]  ;;  %v768_v15 = vld [vmem:[%s3163_s7 + $0x80] sm:$0xff]  ;;  %2339 = vmatprep.mubr.msk.f32.mxu1 %vm2893_vm0, %v2891_v8  ;;  %s3660_s22 = sld [smem:[#allocation22_spill]]  ;;  %s3662_s12 = sld [smem:[#allocation23_spill]] }
  0xa6   : > { %v765_v14 = vld [vmem:[%s3163_s7 + $0x68] sm:$0xff]  ;;  %2398 = vmatprep.subr.bf16.mxu0 %v2397_v4  ;;  %v2403_v16 = vpack.c.bf16 %v761_v13, %v758_v12  ;;  %v764_v18 = vld [vmem:[%s3163_s7 + $0x60] sm:$0xff]  ;;  %v767_v19 = vld [vmem:[%s3163_s7 + $0x78] sm:$0xff]  ;;  %s3664_s2 = sld [smem:[#allocation24_spill]] }
  0xa7   : > { %2400 = vmatpush1.bf16.msra.mxu0 %v2399_v10  ;;  %v2405_v17 = vpack.c.bf16 %v768_v15, %v765_v14  ;;  %v771_v20 = vld [vmem:[%s3163_s7 + $0x98] sm:$0xff]  ;;  %v774_v21 = vld [vmem:[%s3163_s7 + $0xb0] sm:$0xff]  ;;  %v2407_v22 = vpack.c.bf16 %v767_v19, %v764_v18  ;;  %v773_v25 = vld [vmem:[%s3163_s7 + $0xa8] sm:$0xff]  ;;  %v802_v14 = vlaneseq }
  0xa8   : > { %2402 = vmatprep.subr.bf16.mxu0 %v2401_v11  ;;  %v2409_v23 = vpack.c.bf16 %v774_v21, %v771_v20  ;;  %v770_v24 = vld [vmem:[%s3163_s7 + $0x90] sm:$0xff]  ;;  %v777_v26 = vld [vmem:[%s3163_s7 + $0xc8] sm:$0xff]  ;;  %v780_v27 = vld [vmem:[%s3163_s7 + $0xe0] sm:$0xff] }
  0xa9   : > { %v754_v28 = vld [vmem:[%s3163_s7 + $0x10] sm:$0xff]  ;;  %v757_v29 = vld [vmem:[%s3163_s7 + $0x28] sm:$0xff]  ;;  %v760_v30 = vld [vmem:[%s3163_s7 + $0x40] sm:$0xff]  ;;  %v2411_v31 = vpack.c.bf16 %v773_v25, %v770_v24  ;;  %v2413_v34 = vpack.c.bf16 %v780_v27, %v777_v26  ;;  %v3315_v15 = vshrl.u32 %v802_v14, 7 }
  0xaa   : > { %v2430_v32 = vpack.c.bf16 %v757_v29, %v754_v28  ;;  %v763_v33 = vld [vmem:[%s3163_s7 + $0x58] sm:$0xff]  ;;  %v776_v35 = vld [vmem:[%s3163_s7 + $0xc0] sm:$0xff]  ;;  %v786_v38 = vld [vmem:[%s3163_s7 + $0x110] sm:$0xff] }
  0xab   : > { %2404 = vmatpush1.bf16.msra.mxu0 %v2403_v16  ;;  %v779_v36 = vld [vmem:[%s3163_s7 + $0xd8] sm:$0xff]  ;;  %v2433_v39 = vpack.c.bf16 %v763_v33, %v760_v30  ;;  %v766_v40 = vld [vmem:[%s3163_s7 + $0x70] sm:$0xff]  ;;  %v769_v41 = vld [vmem:[%s3163_s7 + $0x88] sm:$0xff]  ;;  %v808_v16 = vsub.s32 1, %v3315_v15  ;;  %v804_v18 = vsub.s32 0, %v3315_v15  ;;  %v812_v25 = vsub.s32 2, %v3315_v15  ;;  %s3663_s15 = scalar_lea.vmem %s3662_s12, %s3184_s18 }
  0xac   : > { %2406 = vmatprep.subr.bf16.mxu0 %v2405_v17  ;;  %v783_v37 = vld [vmem:[%s3163_s7 + $0xf8] sm:$0xff]  ;;  %2431 = vmatpush3.bf16.msra.mxu1 %v2430_v32  ;;  %v2415_v42 = vpack.c.bf16 %v779_v36, %v776_v35  ;;  %v782_v44 = vld [vmem:[%s3163_s7 + $0xf0] sm:$0xff]  ;;  %v785_v45 = vld [vmem:[%s3163_s7 + $0x108] sm:$0xff]  ;;  %v2436_v48 = vpack.c.bf16 %v769_v41, %v766_v40  ;;  %s3665_s10 = scalar_lea.vmem %s3664_s2, %s3184_s18 }
  0xad   : > { %2432 = vmatprep.subr.bf16.mxu1 %v2892_v9  ;;  %v2417_v43 = vpack.c.bf16 %v786_v38, %v783_v37  ;;  %v789_v46 = vld [vmem:[%s3163_s7 + $0x128] sm:$0xff]  ;;  %v792_v47 = vld [vmem:[%s3163_s7 + $0x140] sm:$0xff]  ;;  %v775_v50 = vld [vmem:[%s3163_s7 + $0xb8] sm:$0xff]  ;;  %v2419_v51 = vpack.c.bf16 %v785_v45, %v782_v44 }
  0xae   : > { %v772_v49 = vld [vmem:[%s3163_s7 + $0xa0] sm:$0xff]  ;;  %v2421_v52 = vpack.c.bf16 %v792_v47, %v789_v46  ;;  %v791_v54 = vld [vmem:[%s3163_s7 + $0x138] sm:$0xff]  ;;  %v798_v56 = vld [vmem:[%s3163_s7 + $0x170] sm:$0xff] }
  0xaf   : > { %2408 = vmatpush1.bf16.msra.mxu0 %v2407_v22  ;;  %v788_v53 = vld [vmem:[%s3163_s7 + $0x120] sm:$0xff]  ;;  %v795_v55 = vld [vmem:[%s3163_s7 + $0x158] sm:$0xff]  ;;  %v2439_v57 = vpack.c.bf16 %v775_v50, %v772_v49  ;;  %v778_v58 = vld [vmem:[%s3163_s7 + $0xd0] sm:$0xff] }
  0xb0   : > { %2410 = vmatprep.subr.bf16.mxu0 %v2409_v23  ;;  %2434 = vmatpush3.bf16.msra.mxu1 %v2433_v39  ;;  %v781_v59 = vld [vmem:[%s3163_s7 + $0xe8] sm:$0xff]  ;;  %v2423_v60 = vpack.c.bf16 %v791_v54, %v788_v53  ;;  %v2425_v61 = vpack.c.bf16 %v798_v56, %v795_v55  ;;  %v794_v62 = vld [vmem:[%s3163_s7 + $0x150] sm:$0xff]  ;;  %v784_v1 = vld [vmem:[%s3163_s7 + $0x100] sm:$0xff] }
  0xb1   : > { %2435 = vmatprep.subr.bf16.mxu1 %v2892_v9  ;;  %v797_v63 = vld [vmem:[%s3163_s7 + $0x168] sm:$0xff]  ;;  %v2442_v0 = vpack.c.bf16 %v781_v59, %v778_v58  ;;  %v787_v2 = vld [vmem:[%s3163_s7 + $0x118] sm:$0xff]  ;;  %v790_v5 = vld [vmem:[%s3163_s7 + $0x130] sm:$0xff] }
  0xb2   : > { %v2427_v3 = vpack.c.bf16 %v797_v63, %v794_v62  ;;  %v2445_v4 = vpack.c.bf16 %v787_v2, %v784_v1  ;;  %v793_v6 = vld [vmem:[%s3163_s7 + $0x148] sm:$0xff]  ;;  %v3299_v7 = vld [vmem:[%s3239_s20] sm:$0xff]  ;;  %v799_v12 = vld [vmem:[%s3163_s7 + $0x178] sm:$0xff] }
  0xb3   : > { %2412 = vmatpush1.bf16.msra.mxu0 %v2411_v31  ;;  %v2448_v10 = vpack.c.bf16 %v793_v6, %v790_v5  ;;  %v796_v11 = vld [vmem:[%s3163_s7 + $0x160] sm:$0xff]  ;;  %s3658_s7 = scalar_lea.vmem %s3587_s1, %s3684_s17  ;;  %v1302_v63 = vld [vmem:[%s3208_s8 + $0x8] sm:$0xff]  ;;  %v1304_v2 = vld [vmem:[%s3208_s8 + $0x18] sm:$0xff]  ;;  %s3659_s17 = sld [smem:[#allocation17_spill]] }
  0xb4   : > { %2414 = vmatprep.subr.bf16.mxu0 %v2413_v34  ;;  %2437 = vmatpush3.bf16.msra.mxu1 %v2436_v48  ;;  %v2451_v13 = vpack.c.bf16 %v799_v12, %v796_v11  ;;  %v800_v17 = vld [vmem:[%s3203_s25] sm:$0x7]  ;;  %v1306_v5 = vld [vmem:[%s3208_s8 + $0x28] sm:$0xff]  ;;  %v1308_v11 = vld [vmem:[%s3208_s8 + $0x38] sm:$0xff]  ;;  %s3661_s25 = scalar_lea.vmem %s3660_s22, %s3184_s18 }
  0xb5   : > { %2438 = vmatprep.subr.bf16.mxu1 %v2892_v9  ;;  %v809_v19 = vrot.slane %v800_v17, %v808_v16  ;;  %v805_v21 = vrot.slane %v800_v17, %v804_v18  ;;  %v813_v26 = vrot.slane %v800_v17, %v812_v25  ;;  %v2179_v31 = vld [vmem:[%s3658_s7] ss:$0 sm:$0xff]  ;;  %v1310_v14 = vld [vmem:[%s3208_s8 + $0x48] sm:$0xff] }
  0xb6   : > { %v1301_v62 = vld [vmem:[%s3208_s8] sm:$0xff] }
  0xb7   : > { %2416 = vmatpush1.bf16.msra.mxu0 %v2415_v42  ;;  %v2454_v1 = vpack.c.bf16 %v1302_v63, %v1301_v62 }
  0xb8   : > { %2418 = vmatprep.subr.bf16.mxu0 %v2417_v43  ;;  %2440 = vmatpush3.bf16.msra.mxu1 %v2439_v57 }
  0xb9   : > { %2441 = vmatprep.subr.bf16.mxu1 %v2892_v9  ;;  %v1442_v62 = vld [vmem:[%s3659_s17 + $0x98] sm:$0xff] }
  0xba   : > { %v1446_v63 = vld [vmem:[%s3659_s17 + $0xb8] sm:$0xff] }
  0xbb   : > { %2420 = vmatpush1.bf16.msra.mxu0 %v2419_v51 }
  0xbc   : > { %2422 = vmatprep.subr.bf16.mxu0 %v2421_v52  ;;  %2443 = vmatpush3.bf16.msra.mxu1 %v2442_v0  ;;  %v1303_v0 = vld [vmem:[%s3208_s8 + $0x10] sm:$0xff] }
  0xbd   : > { %2444 = vmatprep.subr.bf16.mxu1 %v2892_v9 }
  0xbf   : > { %2424 = vmatpush1.bf16.msra.mxu0 %v2423_v60 }
  0xc0   : > { %2426 = vmatprep.subr.bf16.mxu0 %v2425_v61  ;;  %2446 = vmatpush3.bf16.msra.mxu1 %v2445_v4  ;;  %v1305_v4 = vld [vmem:[%s3208_s8 + $0x20] sm:$0xff] }
  0xc1   : > { %2447 = vmatprep.subr.bf16.mxu1 %v2892_v9  ;;  %v2460_v6 = vpack.c.bf16 %v1306_v5, %v1305_v4  ;;  %v1445_v4 = vld [vmem:[%s3659_s17 + $0xb0] sm:$0xff] }
  0xc3   : > { %2428 = vmatpush1.bf16.msra.mxu0 %v2427_v3  ;;  %v2457_v3 = vpack.c.bf16 %v1304_v2, %v1303_v0  ;;  %v1439_v0 = vld [vmem:[%s3659_s17 + $0x80] sm:$0xff] }
  0xc4   : > { %2453 = vmatprep.subr.bf16.mxu0 %v2892_v9  ;;  %2449 = vmatpush3.bf16.msra.mxu1 %v2448_v10  ;;  %v1307_v10 = vld [vmem:[%s3208_s8 + $0x30] sm:$0xff]  ;;  %v1443_v2 = vld [vmem:[%s3659_s17 + $0xa0] sm:$0xff] }
  0xc5   : > { %2450 = vmatprep.subr.bf16.mxu1 %v2892_v9  ;;  %v2463_v12 = vpack.c.bf16 %v1308_v11, %v1307_v10  ;;  %v2487_v5 = vpack.c.bf16 %v1443_v2, %v1439_v0  ;;  %v1482_v0 = vld [vmem:[%s3659_s17 + $0x1d8] sm:$0xff] }
  0xc6   : > { %882 = vmatmul.mubr.f32.vlgmr.msra.gmra.mrb[0].mxu0 %v3299_v7 }
  0xc7   : > { %2394 = vmatprep.mubr.msk.f32.mxu0 %vm2893_vm0, %v2891_v8  ;;  %2455 = vmatpush3.bf16.msra.mxu0 %v2454_v1  ;;  %v2517_v1 = vpack.c.bf16 %v1446_v63, %v1442_v62  ;;  %v1480_v62 = vld [vmem:[%s3659_s17 + $0x1c8] sm:$0xff] }
  0xc8   : > { %2452 = vmatpush3.bf16.msra.mxu1 %v2451_v13  ;;  %2456 = vmatprep.subr.bf16.mxu0 %v2892_v9  ;;  %v1309_v13 = vld [vmem:[%s3208_s8 + $0x40] sm:$0xff]  ;;  %v1484_v63 = vld [vmem:[%s3659_s17 + $0x1e8] sm:$0xff] }
  0xc9   : > { %2342 = vmatprep.subr.mxu1 %v2891_v8  ;;  %v2466_v17 = vpack.c.bf16 %v1310_v14, %v1309_v13  ;;  %v1448_v14 = vld [vmem:[%s3659_s17 + $0xc8] sm:$0xff]  ;;  %v2505_v2 = vpack.c.bf16 %v1484_v63, %v1480_v62  ;;  %v1741_v62 = vld [vmem:[%s3241_s13 + $0x1b0] sm:$0xff] }
  0xcb   : > { %2340 = vmatmul.mubr.f32.vlgmr.msra.gmra.mrb[0].mxu1 %v3299_v7  ;;  %2458 = vmatpush3.bf16.msra.mxu0 %v2457_v3  ;;  %v1441_v3 = vld [vmem:[%s3659_s17 + $0x90] sm:$0xff] }
  0xcc   : > { %2344 = vmatprep.mubr.msk.f32.mxu1 %vm2893_vm0, %v2891_v8  ;;  %2459 = vmatprep.subr.bf16.mxu0 %v2892_v9 }
  0xcf   : > { %2461 = vmatpush3.bf16.msra.mxu0 %v2460_v6  ;;  %v2519_v6 = vpack.c.bf16 %v1445_v4, %v1441_v3  ;;  %v1486_v3 = vld [vmem:[%s3659_s17 + $0x1f8] sm:$0xff]  ;;  %v1479_v4 = vld [vmem:[%s3659_s17 + $0x1c0] sm:$0xff] }
  0xd0   : > { %2462 = vmatprep.subr.bf16.mxu0 %v2892_v9 }
  0xd3   : > { %2464 = vmatpush3.bf16.msra.mxu0 %v2463_v12 }
  0xd4   : > { %2465 = vmatprep.subr.bf16.mxu0 %v2892_v9 }
  0xd7   : > { %2467 = vmatpush3.bf16.msra.mxu0 %v2466_v17  ;;  %v1452_v17 = vld [vmem:[%s3659_s17 + $0xe8] sm:$0xff] }
  0xd8   : > { %2468 = vmatprep.subr.bf16.mxu0 %v2892_v9 }
 0x199   : > { %v883_v20 = vpop.f32.mrb[0].mxu0 }
 0x19a   : > { %v885_v22 = vpop.f32.mrb[1].mxu0  ;;  %v884_v24 = vadd.f32 %v883_v20, %v805_v21  ;;  %v1312_v20 = vld [vmem:[%s3208_s8 + $0x58] sm:$0xff] }
 0x19b   : > { %v886_v23 = vadd.f32 %v885_v22, %v809_v19  ;;  %v1311_v19 = vld [vmem:[%s3208_s8 + $0x50] sm:$0xff]  ;;  %v1313_v22 = vld [vmem:[%s3208_s8 + $0x60] sm:$0xff] }
 0x19c   : > { %v2469_v21 = vpack.c.bf16 %v1312_v20, %v1311_v19  ;;  %v1450_v19 = vld [vmem:[%s3659_s17 + $0xd8] sm:$0xff]  ;;  %v2489_v20 = vpack.c.bf16 %v1452_v17, %v1448_v14  ;;  %v1703_v17 = vld [vmem:[%s3241_s13 + $0x80] sm:$0xff] }
 0x19d   : > { %1130 = vrot.lane.b32.xlu1 %v886_v23, %s2894_s3  ;;  %2343 = vmatpush3.xpose.msk.msra.mxu1 %vm958_vm1, %v886_v23  ;;  %v1314_v23 = vld [vmem:[%s3208_s8 + $0x68] sm:$0xff] }
 0x19e   : > { %2347 = vmatprep.subr.mxu1 %v2891_v8  ;;  %v954_v27 = vpop.f32.mrb[0].mxu1  ;;  %2470 = vmatpush3.bf16.msra.mxu0 %v2469_v21  ;;  %v1454_v21 = vld [vmem:[%s3659_s17 + $0xf8] sm:$0xff] }
 0x19f   : > { %v955_v28 = vadd.f32 %v954_v27, %v813_v26  ;;  %v2341_v29 = vpop.f32.mrb[1].mxu1  ;;  %2471 = vmatprep.subr.bf16.mxu0 %v2892_v9  ;;  %v1315_v26 = vld [vmem:[%s3208_s8 + $0x70] sm:$0xff]  ;;  %v1316_v27 = vld [vmem:[%s3208_s8 + $0x78] sm:$0xff] }
 0x1a0   : > { %2345 = vmatmul.mubr.msk.f32.vlgmr.msra.gmra.mrb[2].mxu1 %vm958_vm1, %v884_v24 }
 0x1a1   : > { %1128 = vrot.lane.b32.xlu1 %v884_v24, %s2894_s3  ;;  %2349 = vmatprep.mubr.msk.f32.mxu1 %vm2893_vm0, %v2891_v8  ;;  %v2472_v24 = vpack.c.bf16 %v1314_v23, %v1313_v22  ;;  %v1447_v22 = vld [vmem:[%s3659_s17 + $0xc0] sm:$0xff] }
 0x1a2   : > { %2348 = vmatpush3.msra.mxu1 %v955_v28  ;;  %v1451_v23 = vld [vmem:[%s3659_s17 + $0xe0] sm:$0xff] }
 0x1a3   : > { %2352 = vmatprep.subr.mxu1 %v2891_v8  ;;  %2473 = vmatpush3.bf16.msra.mxu0 %v2472_v24  ;;  %v2521_v24 = vpack.c.bf16 %v1454_v21, %v1450_v19  ;;  %v1704_v19 = vld [vmem:[%s3241_s13 + $0x88] sm:$0xff] }
 0x1a4   : > { %2474 = vmatprep.subr.bf16.mxu0 %v2892_v9  ;;  %v2184_v9 = vld [vmem:[%s3661_s25] ss:$0 sm:$0xff]  ;;  %v2541_v21 = vpack.c.bf16 %v1704_v19, %v1703_v17  ;;  %v1744_v17 = vld [vmem:[%s3241_s13 + $0x1c8] sm:$0xff] }
 0x20f   : > { %v1131_v43 = vpop.permute.xlu1 %1130 }
 0x213   : > { %v1129_v45 = vpop.permute.xlu1 %1128 }
 0x273   : > { %v1031_v30 = vpop.f32.mrb[2].mxu1 }
 0x274   : > { %v1035_v32 = vmul.f32 0.125, %v1031_v30  ;;  %v2346_v33 = vpop.f32.mrb[3].mxu1 }
 0x276   : > { %v1042_v34 = vadd.f32 %v2179_v31, %v1035_v32 }
 0x278   : > { %v1044_v35 = vsel %vm1043_vm2, %v1042_v34, -inf }
 0x279   : > { %1045 = vmax.xlane.f32.xlu0 %v1044_v35 }
 0x306   : > { %v1046_v36 = vpop.xlane.xlu0 %1045 }
 0x307   : > { %v1047_v37 = vsub.f32 %v1042_v34, %v1046_v36 }
 0x309   : > { %v1048_v38 = vmul.f32 1.442695, %v1047_v37  ;;  %v1424_v37 = vld [vmem:[%s3659_s17 + $0x8] sm:$0xff] }
 0x30b   : > { %2700 = vpow2.f32 %v1048_v38  ;;  %v1428_v38 = vld [vmem:[%s3659_s17 + $0x28] sm:$0xff] }
 0x315   : > { %v2701_v39 = vpop.eup %2700 }
 0x316   : > { %v1050_v40 = vsel %vm1043_vm2, %v2701_v39, 0.0 }
 0x317   : > { %1051 = vadd.xlane.f32.xlu0 %v1050_v40  ;;  %v1430_v40 = vld [vmem:[%s3659_s17 + $0x38] sm:$0xff] }
 0x3a4   : > { %v1052_v41 = vpop.xlane.xlu0 %1051 }
 0x3a5   : > { %2702 = vrcp.f32 %v1052_v41  ;;  %v1423_v41 = vld [vmem:[%s3659_s17] sm:$0xff] }
 0x3af   : > { %v2703_v42 = vpop.eup %2702 }
 0x3b0   : > { %v1054_v44 = vmul.f32 %v2703_v42, %v2701_v39  ;;  %v2477_v39 = vpack.c.bf16 %v1428_v38, %v1424_v37  ;;  %v1427_v42 = vld [vmem:[%s3659_s17 + $0x20] sm:$0xff]  ;;  %v1457_v38 = vld [vmem:[%s3659_s17 + $0x110] sm:$0xff] }
 0x3b2   : > { %2350 = vmatmul.mubr.msk.f32.vlgmr.msra.gmra.mrb[4].mxu1 %vm1043_vm2, %v1054_v44  ;;  %v2479_v44 = vpack.c.bf16 %v1427_v42, %v1423_v41  ;;  %v1468_v41 = vld [vmem:[%s3659_s17 + $0x168] sm:$0xff]  ;;  %v1466_v42 = vld [vmem:[%s3659_s17 + $0x158] sm:$0xff] }
 0x3b3   : > { %2353 = vmatpush3.xpose.msk.msra.mxu1 %vm958_vm1, %v1131_v43  ;;  %2354 = vmatprep.mubr.msk.f32.mxu1 %vm2893_vm0, %v2891_v8 }
 0x3b4   : > { %2357 = vmatprep.subr.mxu1 %v2891_v8 }
 0x3b6   : > { %2355 = vmatmul.mubr.msk.f32.vlgmr.msra.gmra.mrb[6].mxu1 %vm958_vm1, %v1129_v45  ;;  %v1425_v45 = vld [vmem:[%s3659_s17 + $0x10] sm:$0xff] }
 0x3b7   : > { %2359 = vmatprep.mubr.msk.f32.mxu1 %vm2893_vm0, %v2891_v8 }
 0x485   : > { %v3350_v46 = vpop.f32.mrb[4].mxu1 }
 0x486   : > { %v2351_v47 = vpop.f32.mrb[5].mxu1 }
 0x489   : > { %v1202_v48 = vpop.f32.mrb[6].mxu1 }
 0x48a   : > { %v1206_v49 = vmul.f32 0.125, %v1202_v48  ;;  %v2356_v50 = vpop.f32.mrb[7].mxu1  ;;  %v1436_v48 = vld [vmem:[%s3659_s17 + $0x68] sm:$0xff] }
 0x48b   : > { %v1438_v50 = vld [vmem:[%s3659_s17 + $0x78] sm:$0xff] }
 0x48c   : > { %v1207_v51 = vadd.f32 %v2179_v31, %v1206_v49  ;;  %v1434_v49 = vld [vmem:[%s3659_s17 + $0x58] sm:$0xff] }
 0x48e   : > { %v1208_v52 = vsel %vm1043_vm2, %v1207_v51, -inf }
 0x48f   : > { %1209 = vmax.xlane.f32.xlu0 %v1208_v52  ;;  %v2513_v52 = vpack.c.bf16 %v1438_v50, %v1434_v49  ;;  %v1469_v49 = vld [vmem:[%s3659_s17 + $0x170] sm:$0xff]  ;;  %v1472_v50 = vld [vmem:[%s3659_s17 + $0x188] sm:$0xff] }
 0x4a5   : > { %1220 = vrot.lane.b32.xlu0 %v955_v28, %s2894_s3  ;;  %v2475_v28 = vpack.c.bf16 %v1316_v27, %v1315_v26  ;;  %v2491_v26 = vpack.c.bf16 %v1451_v23, %v1447_v22  ;;  %v1449_v27 = vld [vmem:[%s3659_s17 + $0xd0] sm:$0xff]  ;;  %v1736_v22 = vld [vmem:[%s3241_s13 + $0x188] sm:$0xff] }
 0x4a7   : > { %2476 = vmatpush3.bf16.msra.mxu0 %v2475_v28  ;;  %v1453_v28 = vld [vmem:[%s3659_s17 + $0xf0] sm:$0xff] }
 0x51c   : > { %v1210_v53 = vpop.xlane.xlu0 %1209 }
 0x51d   : > { %v1211_v54 = vsub.f32 %v1207_v51, %v1210_v53  ;;  %v1431_v53 = vld [vmem:[%s3659_s17 + $0x40] sm:$0xff] }
 0x51f   : > { %v1212_v55 = vmul.f32 1.442695, %v1211_v54  ;;  %v1435_v54 = vld [vmem:[%s3659_s17 + $0x60] sm:$0xff] }
 0x520   : > { %v1221_v56 = vpop.permute.xlu0 %1220 }
 0x521   : > { %2704 = vpow2.f32 %v1212_v55  ;;  %2358 = vmatpush3.msra.mxu1 %v1221_v56  ;;  %v1433_v55 = vld [vmem:[%s3659_s17 + $0x50] sm:$0xff]  ;;  %v2483_v56 = vpack.c.bf16 %v1435_v54, %v1431_v53  ;;  %v1474_v54 = vld [vmem:[%s3659_s17 + $0x198] sm:$0xff] }
 0x522   : > { %2478 = vmatprep.subr.bf16.mxu1 %v2477_v39  ;;  %v1464_v39 = vld [vmem:[%s3659_s17 + $0x148] sm:$0xff] }
 0x52b   : > { %v2705_v57 = vpop.eup %2704 }
 0x52c   : > { %v1214_v58 = vsel %vm1043_vm2, %v2705_v57, 0.0 }
 0x52d   : > { %1215 = vadd.xlane.f32.xlu1 %v1214_v58  ;;  %v1440_v58 = vld [vmem:[%s3659_s17 + $0x88] sm:$0xff] }
 0x5ba   : > { %v1216_v59 = vpop.xlane.xlu1 %1215 }
 0x5bb   : > { %2706 = vrcp.f32 %v1216_v59  ;;  %v1444_v59 = vld [vmem:[%s3659_s17 + $0xa8] sm:$0xff] }
 0x5c5   : > { %v2707_v60 = vpop.eup %2706 }
 0x5c6   : > { %v1218_v61 = vmul.f32 %v2707_v60, %v2705_v57  ;;  %v1437_v57 = vld [vmem:[%s3659_s17 + $0x70] sm:$0xff] }
 0x5c7   : > { %v2515_v60 = vpack.c.bf16 %v1437_v57, %v1433_v55  ;;  %v1478_v55 = vld [vmem:[%s3659_s17 + $0x1b8] sm:$0xff] }
 0x5c8   : > { %2360 = vmatmul.mubr.msk.f32.vlgmr.msra.gmra.mrb[8].mxu1 %vm1043_vm2, %v1218_v61  ;;  %v2485_v61 = vpack.c.bf16 %v1444_v59, %v1440_v58  ;;  %v2533_v57 = vpack.c.bf16 %v1478_v55, %v1474_v54  ;;  %v1475_v58 = vld [vmem:[%s3659_s17 + $0x1a0] sm:$0xff]  ;;  %v1473_v59 = vld [vmem:[%s3659_s17 + $0x190] sm:$0xff]  ;;  %v1692_v54 = vld [vmem:[%s3241_s13 + $0x28] sm:$0xff] }
 0x5c9   : > { %1573 = vmatprep.mubr.f32.mxu1 %v2891_v8  ;;  %2480 = vmatpush1.bf16.msra.mxu1 %v2479_v44  ;;  %v2497_v44 = vpack.c.bf16 %v1468_v41, %v1464_v39  ;;  %v1737_v39 = vld [vmem:[%s3241_s13 + $0x190] sm:$0xff]  ;;  %v1738_v41 = vld [vmem:[%s3241_s13 + $0x198] sm:$0xff] }
 0x69b   : > { %v1292_v29 = vpop.f32.mrb[8].mxu1 }
 0x69c   : > { %1297 = vrot.lane.b32.xlu0 %v1292_v29, %s2894_s3  ;;  %v2361_v30 = vpop.f32.mrb[9].mxu1  ;;  %v2523_v29 = vpack.c.bf16 %v1453_v28, %v1449_v27 }
 0x69d   : > { %v1456_v30 = vld [vmem:[%s3659_s17 + $0x108] sm:$0xff] }
 0x70e   : > { %v1298_v31 = vpop.permute.xlu0 %1297 }
 0x70f   : > { %v1300_v32 = vsel %vm958_vm1, %v3350_v46, %v1298_v31  ;;  %v1429_v46 = vld [vmem:[%s3659_s17 + $0x30] sm:$0xff]  ;;  %v1460_v31 = vld [vmem:[%s3659_s17 + $0x128] sm:$0xff] }
 0x710   : > { %2395 = vmatmul.mubr.f32.vlgmr.msra.gmra.mrb[2].mxu0 %v1300_v32  ;;  %v2511_v47 = vpack.c.bf16 %v1429_v46, %v1425_v45  ;;  %v1458_v32 = vld [vmem:[%s3659_s17 + $0x118] sm:$0xff]  ;;  %v1463_v46 = vld [vmem:[%s3659_s17 + $0x140] sm:$0xff] }
 0x711   : > { %1644 = vmatprep.mubr.f32.mxu0 %v2891_v8  ;;  %v1426_v8 = vld [vmem:[%s3659_s17 + $0x18] sm:$0xff] }
 0x712   : > { %v2509_v43 = vpack.c.bf16 %v1430_v40, %v1426_v8  ;;  %v1461_v8 = vld [vmem:[%s3659_s17 + $0x130] sm:$0xff] }
 0x713   : > { %v2527_v40 = vpack.c.bf16 %v1461_v8, %v1457_v38  ;;  %v1706_v8 = vld [vmem:[%s3241_s13 + $0x98] sm:$0xff] }
 0x714   : > { %2510 = vmatprep.subr.bf16.mxu0 %v2509_v43  ;;  %v1470_v43 = vld [vmem:[%s3659_s17 + $0x178] sm:$0xff] }
 0x715   : > { %2512 = vmatpush1.bf16.msra.mxu0 %v2511_v47  ;;  %v2529_v45 = vpack.c.bf16 %v1470_v43, %v1466_v42  ;;  %v1465_v47 = vld [vmem:[%s3659_s17 + $0x150] sm:$0xff]  ;;  %v1690_v43 = vld [vmem:[%s3241_s13 + $0x18] sm:$0xff] }
 0x716   : > { %2514 = vmatprep.subr.bf16.mxu0 %v2513_v52  ;;  %v2531_v52 = vpack.c.bf16 %v1469_v49, %v1465_v47  ;;  %v1689_v42 = vld [vmem:[%s3241_s13 + $0x10] sm:$0xff]  ;;  %v1708_v49 = vld [vmem:[%s3241_s13 + $0xa8] sm:$0xff] }
 0x719   : > { %2516 = vmatpush1.bf16.msra.mxu0 %v2515_v60  ;;  %v1477_v60 = vld [vmem:[%s3659_s17 + $0x1b0] sm:$0xff] }
 0x71a   : > { %2518 = vmatprep.subr.bf16.mxu0 %v2517_v1  ;;  %v2535_v1 = vpack.c.bf16 %v1477_v60, %v1473_v59  ;;  %v1709_v60 = vld [vmem:[%s3241_s13 + $0xb0] sm:$0xff] }
 0x71d   : > { %2520 = vmatpush1.bf16.msra.mxu0 %v2519_v6  ;;  %v2537_v6 = vpack.c.bf16 %v1486_v3, %v1482_v0  ;;  %v1742_v0 = vld [vmem:[%s3241_s13 + $0x1b8] sm:$0xff] }
 0x71e   : > { %2522 = vmatprep.subr.bf16.mxu0 %v2521_v24  ;;  %v2585_v3 = vpack.c.bf16 %v1742_v0, %v1741_v62  ;;  %v1503_v62 = vsub.s32 3, %v3315_v15 }
 0x721   : > { %2524 = vmatpush1.bf16.msra.mxu0 %v2523_v29  ;;  %v2185_v29 = vld [vmem:[%s3663_s15] ss:$0 sm:$0xff] }
 0x7e3   : > { %v1390_v33 = vpop.f32.mrb[2].mxu0 }
 0x7e4   : > { %v1391_v34 = vadd.f32 %v2184_v9, %v1390_v33  ;;  %v2396_v35 = vpop.f32.mrb[3].mxu0  ;;  %v2493_v9 = vpack.c.bf16 %v1460_v31, %v1456_v30  ;;  %v1462_v33 = vld [vmem:[%s3659_s17 + $0x138] sm:$0xff]  ;;  %v1687_v30 = vld [vmem:[%s3241_s13] sm:$0xff] }
 0x7e5   : > { %v1459_v35 = vld [vmem:[%s3659_s17 + $0x120] sm:$0xff] }
 0x7e6   : > { %v1394_v36 = vadd.f32 %v1391_v34, %v3299_v7  ;;  %v1432_v7 = vld [vmem:[%s3659_s17 + $0x48] sm:$0xff]  ;;  %v1455_v34 = vld [vmem:[%s3659_s17 + $0x100] sm:$0xff] }
 0x7e7   : > { %v2481_v51 = vpack.c.bf16 %v1436_v48, %v1432_v7  ;;  %v2495_v37 = vpack.c.bf16 %v1459_v35, %v1455_v34  ;;  %v1467_v7 = vld [vmem:[%s3659_s17 + $0x160] sm:$0xff] }
 0x7e8   : > { %1397 = vadd.xlane.f32.xlu0 %v1394_v36  ;;  %v2499_v48 = vpack.c.bf16 %v1467_v7, %v1463_v46  ;;  %v2186_v34 = vld [vmem:[%s3665_s10] ss:$0 sm:$0xff]  ;;  %v1721_v46 = vld [vmem:[%s3241_s13 + $0x110] sm:$0xff]  ;;  %v1722_v7 = vld [vmem:[%s3241_s13 + $0x118] sm:$0xff] }
 0x7e9   : > { %2482 = vmatprep.subr.bf16.mxu1 %v2481_v51  ;;  %v1476_v51 = vld [vmem:[%s3659_s17 + $0x1a8] sm:$0xff]  ;;  %v2579_v47 = vpack.c.bf16 %v1722_v7, %v1721_v46  ;;  %v1731_v46 = vld [vmem:[%s3241_s13 + $0x160] sm:$0xff] }
 0x7ea   : > { %2484 = vmatpush1.bf16.msra.mxu1 %v2483_v56  ;;  %v2501_v53 = vpack.c.bf16 %v1476_v51, %v1472_v50  ;;  %v1471_v56 = vld [vmem:[%s3659_s17 + $0x180] sm:$0xff]  ;;  %v1732_v7 = vld [vmem:[%s3241_s13 + $0x168] sm:$0xff] }
 0x7eb   : > { %2486 = vmatprep.subr.bf16.mxu1 %v2485_v61  ;;  %v2503_v61 = vpack.c.bf16 %v1475_v58, %v1471_v56  ;;  %v1739_v50 = vld [vmem:[%s3241_s13 + $0x1a0] sm:$0xff]  ;;  %v1724_v58 = vld [vmem:[%s3241_s13 + $0x128] sm:$0xff] }
 0x7ee   : > { %2488 = vmatpush1.bf16.msra.mxu1 %v2487_v5  ;;  %v1483_v5 = vld [vmem:[%s3659_s17 + $0x1e0] sm:$0xff] }
 0x7ef   : > { %2490 = vmatprep.subr.bf16.mxu1 %v2489_v20  ;;  %v1735_v20 = vld [vmem:[%s3241_s13 + $0x180] sm:$0xff] }
 0x7f0   : > { %v2573_v23 = vpack.c.bf16 %v1736_v22, %v1735_v20  ;;  %v1696_v22 = vld [vmem:[%s3241_s13 + $0x48] sm:$0xff] }
 0x7f2   : > { %2492 = vmatpush1.bf16.msra.mxu1 %v2491_v26 }
 0x7f3   : > { %2494 = vmatprep.subr.bf16.mxu1 %v2493_v9  ;;  %v1719_v9 = vld [vmem:[%s3241_s13 + $0x100] sm:$0xff] }
 0x7f6   : > { %2496 = vmatpush1.bf16.msra.mxu1 %v2495_v37 }
 0x7f7   : > { %2498 = vmatprep.subr.bf16.mxu1 %v2497_v44  ;;  %v2577_v44 = vpack.c.bf16 %v1738_v41, %v1737_v39  ;;  %v1747_v39 = vld [vmem:[%s3241_s13 + $0x1e0] sm:$0xff] }
 0x7fa   : > { %2500 = vmatpush1.bf16.msra.mxu1 %v2499_v48  ;;  %v1707_v48 = vld [vmem:[%s3241_s13 + $0xa0] sm:$0xff] }
 0x7fb   : > { %2502 = vmatprep.subr.bf16.mxu1 %v2501_v53  ;;  %v2549_v51 = vpack.c.bf16 %v1708_v49, %v1707_v48  ;;  %v1691_v53 = vld [vmem:[%s3241_s13 + $0x20] sm:$0xff]  ;;  %v1718_v48 = vld [vmem:[%s3241_s13 + $0xf8] sm:$0xff]  ;;  %v1749_v49 = vld [vmem:[%s3241_s13 + $0x1f0] sm:$0xff] }
 0x7fc   : > { %v2551_v56 = vpack.c.bf16 %v1692_v54, %v1691_v53  ;;  %v1701_v54 = vld [vmem:[%s3241_s13 + $0x70] sm:$0xff] }
 0x7fe   : > { %2504 = vmatpush1.bf16.msra.mxu1 %v2503_v61  ;;  %v1710_v61 = vld [vmem:[%s3241_s13 + $0xb8] sm:$0xff] }
 0x7ff   : > { %2506 = vmatprep.subr.bf16.mxu1 %v2505_v2  ;;  %v2553_v63 = vpack.c.bf16 %v1710_v61, %v1709_v60  ;;  %v1694_v2 = vld [vmem:[%s3241_s13 + $0x38] sm:$0xff]  ;;  %v1487_v61 = vld [vmem:[%s3226_s23] sm:$0xf] }
 0x800   : > { %v1500_v0 = vrot.slane %v1487_v61, %v812_v25 }
 0x875   : > { %v1398_v10 = vpop.xlane.xlu0 %1397 }
 0x876   : > { %v1400_v11 = vmul.f32 0.0078125, %v1398_v10  ;;  %v1481_v10 = vld [vmem:[%s3659_s17 + $0x1d0] sm:$0xff] }
 0x878   : > { %v3414_v12 = vsub.f32 %v1394_v36, %v1400_v11  ;;  %v2525_v36 = vpack.c.bf16 %v1462_v33, %v1458_v32  ;;  %v1485_v11 = vld [vmem:[%s3659_s17 + $0x1f0] sm:$0xff]  ;;  %v1688_v32 = vld [vmem:[%s3241_s13 + $0x8] sm:$0xff] }
 0x879   : > { %v2539_v14 = vpack.c.bf16 %v1485_v11, %v1481_v10  ;;  %v1720_v33 = vld [vmem:[%s3241_s13 + $0x108] sm:$0xff]  ;;  %v1711_v10 = vld [vmem:[%s3241_s13 + $0xc0] sm:$0xff] }
 0x87a   : > { %v1402_v13 = vmul.f32 %v3414_v12, %v3414_v12  ;;  %2526 = vmatprep.subr.bf16.mxu0 %v2525_v36  ;;  %v2543_v36 = vpack.c.bf16 %v1688_v32, %v1687_v30  ;;  %v2575_v37 = vpack.c.bf16 %v1720_v33, %v1719_v9  ;;  %v1746_v32 = vld [vmem:[%s3241_s13 + $0x1d8] sm:$0xff]  ;;  %v1697_v9 = vld [vmem:[%s3241_s13 + $0x50] sm:$0xff] }
 0x87b   : > { %2528 = vmatpush1.bf16.msra.mxu0 %v2527_v40 }
 0x87c   : > { %1403 = vadd.xlane.f32.xlu1 %v1402_v13  ;;  %2530 = vmatprep.subr.bf16.mxu0 %v2529_v45  ;;  %v2507_v13 = vpack.c.bf16 %v1483_v5, %v1479_v4  ;;  %v2547_v45 = vpack.c.bf16 %v1690_v43, %v1689_v42  ;;  %v1725_v5 = vld [vmem:[%s3241_s13 + $0x130] sm:$0xff]  ;;  %v1748_v42 = vld [vmem:[%s3241_s13 + $0x1e8] sm:$0xff]  ;;  %v1699_v43 = vld [vmem:[%s3241_s13 + $0x60] sm:$0xff] }
 0x87e   : > { %2508 = vmatpush1.bf16.msra.mxu1 %v2507_v13  ;;  %v1712_v13 = vld [vmem:[%s3241_s13 + $0xc8] sm:$0xff] }
 0x87f   : > { %2532 = vmatpush1.bf16.msra.mxu0 %v2531_v52  ;;  %2542 = vmatprep.subr.bf16.mxu1 %v2541_v21  ;;  %v1740_v52 = vld [vmem:[%s3241_s13 + $0x1a8] sm:$0xff]  ;;  %v2557_v19 = vpack.c.bf16 %v1712_v13, %v1711_v10  ;;  %v1695_v21 = vld [vmem:[%s3241_s13 + $0x40] sm:$0xff] }
 0x880   : > { %2534 = vmatprep.subr.bf16.mxu0 %v2533_v57  ;;  %v2581_v55 = vpack.c.bf16 %v1740_v52, %v1739_v50  ;;  %v1723_v57 = vld [vmem:[%s3241_s13 + $0x120] sm:$0xff]  ;;  %v1750_v50 = vld [vmem:[%s3241_s13 + $0x1f8] sm:$0xff]  ;;  %v2599_v52 = vpack.c.bf16 %v1732_v7, %v1731_v46 }
 0x881   : > { %v2583_v59 = vpack.c.bf16 %v1724_v58, %v1723_v57  ;;  %v1733_v57 = vld [vmem:[%s3241_s13 + $0x170] sm:$0xff]  ;;  %v1734_v58 = vld [vmem:[%s3241_s13 + $0x178] sm:$0xff] }
 0x882   : > { %v2603_v60 = vpack.c.bf16 %v1734_v58, %v1733_v57 }
 0x883   : > { %2536 = vmatpush1.bf16.msra.mxu0 %v2535_v1  ;;  %v1693_v1 = vld [vmem:[%s3241_s13 + $0x30] sm:$0xff] }
 0x884   : > { %2538 = vmatprep.subr.bf16.mxu0 %v2537_v6  ;;  %v2555_v4 = vpack.c.bf16 %v1694_v2, %v1693_v1  ;;  %v1726_v6 = vld [vmem:[%s3241_s13 + $0x138] sm:$0xff]  ;;  %v1496_v1 = vrot.slane %v1487_v61, %v808_v16  ;;  %v1504_v2 = vrot.slane %v1487_v61, %v1503_v62 }
 0x885   : > { %v2587_v11 = vpack.c.bf16 %v1726_v6, %v1725_v5 }
 0x887   : > { %2540 = vmatpush1.bf16.msra.mxu0 %v2539_v14  ;;  %v1743_v14 = vld [vmem:[%s3241_s13 + $0x1c0] sm:$0xff] }
 0x888   : > { %2574 = vmatprep.subr.bf16.mxu0 %v2573_v23  ;;  %v2589_v20 = vpack.c.bf16 %v1744_v17, %v1743_v14  ;;  %v1727_v23 = vld [vmem:[%s3241_s13 + $0x140] sm:$0xff] }
 0x909   : > { %v1404_v24 = vpop.xlane.xlu1 %1403 }
 0x90a   : > { %v1405_v26 = vmul.f32 0.0078125, %v1404_v24  ;;  %v2559_v24 = vpack.c.bf16 %v1696_v22, %v1695_v21 }
 0x90c   : > { %v1406_v27 = vadd.f32 1e-12, %v1405_v26  ;;  %v1728_v26 = vld [vmem:[%s3241_s13 + $0x148] sm:$0xff] }
 0x90e   : > { %2708 = vrsqrt.f32 %v1406_v27  ;;  %v1713_v27 = vld [vmem:[%s3241_s13 + $0xd0] sm:$0xff] }
 0x918   : > { %v2709_v28 = vpop.eup %2708 }
 0x919   : > { %v1408_v31 = vmul.f32 %v2709_v28, %v3414_v12  ;;  %v1705_v12 = vld [vmem:[%s3241_s13 + $0x90] sm:$0xff]  ;;  %v1714_v28 = vld [vmem:[%s3241_s13 + $0xd8] sm:$0xff] }
 0x91a   : > { %v2545_v40 = vpack.c.bf16 %v1706_v8, %v1705_v12  ;;  %v2561_v30 = vpack.c.bf16 %v1714_v28, %v1713_v27  ;;  %v1715_v12 = vld [vmem:[%s3241_s13 + $0xe0] sm:$0xff]  ;;  %v1716_v8 = vld [vmem:[%s3241_s13 + $0xe8] sm:$0xff] }
 0x91b   : > { %v1415_v35 = vmul.f32 %v2185_v29, %v1408_v31  ;;  %v2591_v29 = vpack.c.bf16 %v1728_v26, %v1727_v23  ;;  %v1745_v31 = vld [vmem:[%s3241_s13 + $0x1d0] sm:$0xff]  ;;  %v2565_v41 = vpack.c.bf16 %v1716_v8, %v1715_v12 }
 0x91c   : > { %v2593_v33 = vpack.c.bf16 %v1746_v32, %v1745_v31 }
 0x91d   : > { %v3477_v38 = vadd.f32 %v2186_v34, %v1415_v35  ;;  %v1698_v34 = vld [vmem:[%s3241_s13 + $0x58] sm:$0xff]  ;;  %v1729_v35 = vld [vmem:[%s3241_s13 + $0x150] sm:$0xff] }
 0x91f   : > { %1574 = vmatmul.mubr.f32.vlgmr.msra.gmra.mrb[10].mxu1 %v3477_v38  ;;  %1645 = vmatmul.mubr.f32.vlgmr.msra.gmra.mrb[4].mxu0 %v3477_v38 }
 0x920   : > { %2544 = vmatpush3.bf16.msra.mxu1 %v2543_v36  ;;  %2576 = vmatpush3.bf16.msra.mxu0 %v2575_v37  ;;  %v1730_v36 = vld [vmem:[%s3241_s13 + $0x158] sm:$0xff]  ;;  %v2563_v37 = vpack.c.bf16 %v1698_v34, %v1697_v9 }
 0x921   : > { %2546 = vmatprep.subr.bf16.mxu1 %v2545_v40  ;;  %2578 = vmatprep.subr.bf16.mxu0 %v2577_v44  ;;  %v2595_v40 = vpack.c.bf16 %v1730_v36, %v1729_v35  ;;  %v1700_v44 = vld [vmem:[%s3241_s13 + $0x68] sm:$0xff] }
 0x924   : > { %2548 = vmatpush3.bf16.msra.mxu1 %v2547_v45  ;;  %2580 = vmatpush3.bf16.msra.mxu0 %v2579_v47  ;;  %v2597_v45 = vpack.c.bf16 %v1748_v42, %v1747_v39  ;;  %v1717_v47 = vld [vmem:[%s3241_s13 + $0xf0] sm:$0xff] }
 0x925   : > { %2550 = vmatprep.subr.bf16.mxu1 %v2549_v51  ;;  %2582 = vmatprep.subr.bf16.mxu0 %v2581_v55  ;;  %v2567_v51 = vpack.c.bf16 %v1700_v44, %v1699_v43  ;;  %v2569_v53 = vpack.c.bf16 %v1718_v48, %v1717_v47  ;;  %v1702_v55 = vld [vmem:[%s3241_s13 + $0x78] sm:$0xff] }
 0x928   : > { %2552 = vmatpush3.bf16.msra.mxu1 %v2551_v56  ;;  %2584 = vmatpush3.bf16.msra.mxu0 %v2583_v59  ;;  %v2601_v56 = vpack.c.bf16 %v1750_v50, %v1749_v49  ;;  %v2571_v59 = vpack.c.bf16 %v1702_v55, %v1701_v54  ;;  %v2187_v50 = vld [vmem:[%s733_s9] ss:$0 sm:$0xff] }
 0x929   : > { %2554 = vmatprep.subr.bf16.mxu1 %v2553_v63  ;;  %2586 = vmatprep.subr.bf16.mxu0 %v2585_v3  ;;  %v1492_v63 = vrot.slane %v1487_v61, %v804_v18 }
 0x92c   : > { %2556 = vmatpush3.bf16.msra.mxu1 %v2555_v4  ;;  %2588 = vmatpush3.bf16.msra.mxu0 %v2587_v11 }
 0x92d   : > { %2558 = vmatprep.subr.bf16.mxu1 %v2557_v19  ;;  %2590 = vmatprep.subr.bf16.mxu0 %v2589_v20 }
 0x930   : > { %2560 = vmatpush3.bf16.msra.mxu1 %v2559_v24  ;;  %2592 = vmatpush3.bf16.msra.mxu0 %v2591_v29 }
 0x931   : > { %2562 = vmatprep.subr.bf16.mxu1 %v2561_v30  ;;  %2594 = vmatprep.subr.bf16.mxu0 %v2593_v33 }
 0x934   : > { %2564 = vmatpush3.bf16.msra.mxu1 %v2563_v37  ;;  %2596 = vmatpush3.bf16.msra.mxu0 %v2595_v40 }
 0x935   : > { %2566 = vmatprep.subr.bf16.mxu1 %v2565_v41  ;;  %2598 = vmatprep.subr.bf16.mxu0 %v2597_v45 }
 0x938   : > { %2568 = vmatpush3.bf16.msra.mxu1 %v2567_v51  ;;  %2600 = vmatpush3.bf16.msra.mxu0 %v2599_v52 }
 0x939   : > { %2570 = vmatprep.subr.bf16.mxu1 %v2569_v53  ;;  %2602 = vmatprep.subr.bf16.mxu0 %v2601_v56 }
 0x93c   : > { %2572 = vmatpush3.bf16.msra.mxu1 %v2571_v59  ;;  %2604 = vmatpush3.bf16.msra.mxu0 %v2603_v60 }
 0x9f2   : > { %v1575_v3 = vpop.f32.mrb[10].mxu1  ;;  %v1646_v4 = vpop.f32.mrb[4].mxu0 }
 0x9f3   : > { %v1576_v5 = vadd.f32 %v1575_v3, %v1492_v63  ;;  %v1647_v6 = vadd.f32 %v1646_v4, %v1500_v0  ;;  %v1577_v10 = vpop.f32.mrb[11].mxu1  ;;  %v1648_v11 = vpop.f32.mrb[5].mxu0 }
 0x9f4   : > { %v1578_v13 = vadd.f32 %v1577_v10, %v1496_v1  ;;  %v1649_v14 = vadd.f32 %v1648_v11, %v1504_v2  ;;  %v2188_v2 = vld [vmem:[%s736_s4] ss:$0 sm:$0xff] }
 0x9f5   : > { %v1655_v17 = vmul.f32 0.044715, %v1576_v5  ;;  %v1657_v19 = vmul.f32 0.044715, %v1647_v6  ;;  %v1651_v42 = vmul.f32 0.5, %v1576_v5  ;;  %v1653_v44 = vmul.f32 0.5, %v1647_v6 }
 0x9f6   : > { %v1656_v20 = vmul.f32 0.044715, %v1578_v13  ;;  %v1658_v21 = vmul.f32 0.044715, %v1649_v14  ;;  %v1652_v12 = vmul.f32 0.5, %v1578_v13  ;;  %v1654_v40 = vmul.f32 0.5, %v1649_v14 }
 0x9f7   : > { %v1659_v18 = vmul.f32 %v1655_v17, %v1576_v5  ;;  %v1661_v22 = vmul.f32 %v1657_v19, %v1647_v6 }
 0x9f8   : > { %v1660_v23 = vmul.f32 %v1656_v20, %v1578_v13  ;;  %v1662_v25 = vmul.f32 %v1658_v21, %v1649_v14 }
 0x9f9   : > { %v1663_v24 = vmul.f32 %v1659_v18, %v1576_v5  ;;  %v1665_v15 = vmul.f32 %v1661_v22, %v1647_v6 }
 0x9fa   : > { %v1664_v16 = vmul.f32 %v1660_v23, %v1578_v13  ;;  %v1666_v26 = vmul.f32 %v1662_v25, %v1649_v14 }
 0x9fb   : > { %v1667_v27 = vadd.f32 %v1663_v24, %v1576_v5  ;;  %v1669_v28 = vadd.f32 %v1665_v15, %v1647_v6 }
 0x9fc   : > { %v1668_v29 = vadd.f32 %v1664_v16, %v1578_v13  ;;  %v1670_v30 = vadd.f32 %v1666_v26, %v1649_v14 }
 0x9fd   : > { %v1671_v31 = vmul.f32 0.7978846, %v1667_v27  ;;  %v1673_v33 = vmul.f32 0.7978846, %v1669_v28 }
 0x9fe   : > { %v1672_v32 = vmul.f32 0.7978846, %v1668_v29  ;;  %v1674_v9 = vmul.f32 0.7978846, %v1670_v30 }
 0x9ff   : > { %2710 = vtanh.f32 %v1671_v31 }
 0xa00   : > { %2712 = vtanh.f32 %v1672_v32 }
 0xa01   : > { %2714 = vtanh.f32 %v1674_v9 }
 0xa02   : > { %2716 = vtanh.f32 %v1673_v33 }
 0xa09   : > { %v2711_v34 = vpop.eup %2710 }
 0xa0a   : > { %v2713_v35 = vpop.eup %2712  ;;  %v1679_v36 = vadd.f32 1.0, %v2711_v34 }
 0xa0b   : > { %v2715_v37 = vpop.eup %2714  ;;  %v1680_v8 = vadd.f32 1.0, %v2713_v35 }
 0xa0c   : > { %v2717_v39 = vpop.eup %2716  ;;  %v1682_v41 = vadd.f32 1.0, %v2715_v37  ;;  %v1683_v7 = vmul.f32 %v1679_v36, %v1651_v42 }
 0xa0d   : > { %v1684_v43 = vmul.f32 %v1680_v8, %v1652_v12  ;;  %v1681_v45 = vadd.f32 1.0, %v2717_v39 }
 0xa0e   : > { %v1686_v46 = vmul.f32 %v1682_v41, %v1654_v40 }
 0xa0f   : > { %1822 = vmatprep.mubr.f32.mxu1 %v1684_v43  ;;  %v1685_v47 = vmul.f32 %v1681_v45, %v1653_v44 }
 0xa10   : > { %1892 = vmatprep.mubr.f32.mxu0 %v1686_v46  ;;  %1823 = vmatmul.mubr.f32.vlgmr.msra.gmra.mrb[12].mxu1 %v1683_v7 }
 0xa11   : > { %1893 = vmatmul.mubr.f32.vlgmr.msra.gmra.mrb[6].mxu0 %v1685_v47 }
 0xae3   : > { %v2269_v48 = vpop.f32.mrb[12].mxu1 }
 0xae4   : > { %v2304_v49 = vpop.f32.mrb[6].mxu0  ;;  %v2270_v51 = vpop.f32.mrb[13].mxu1 }
 0xae5   : > { %v2271_v52 = vadd.f32 %v2270_v51, %v2269_v48  ;;  %v2305_v53 = vpop.f32.mrb[7].mxu0 }
 0xae6   : > { %v2306_v54 = vadd.f32 %v2305_v53, %v2304_v49 }
 0xae7   : > { %v1825_v55 = vadd.f32 %v2271_v52, %v2187_v50 }
 0xae9   : > { %v1895_v56 = vadd.f32 %v2306_v54, %v1825_v55 }
 0xaeb   : > { %v1898_v57 = vadd.f32 %v1895_v56, %v3477_v38  ;;  %v2189_v38 = vld [vmem:[%s739_s6] ss:$0 sm:$0xff] }
 0xaed   : > { %1901 = vadd.xlane.f32.xlu1 %v1898_v57 }
 0xb7a   : > { %v1902_v58 = vpop.xlane.xlu1 %1901 }
 0xb7b   : > { %v1903_v59 = vmul.f32 0.0078125, %v1902_v58 }
 0xb7d   : > { %v1904_v60 = vsub.f32 %v1898_v57, %v1903_v59 }
 0xb7f   : > { %v1905_v61 = vmul.f32 %v1904_v60, %v1904_v60 }
 0xb81   : > { %1906 = vadd.xlane.f32.xlu1 %v1905_v61 }
 0xc0e   : > { %v1907_v62 = vpop.xlane.xlu1 %1906 }
 0xc0f   : > { %v1908_v63 = vmul.f32 0.0078125, %v1907_v62 }
 0xc11   : > { %v1909_v0 = vadd.f32 1e-12, %v1908_v63 }
 0xc13   : > { %2718 = vrsqrt.f32 %v1909_v0 }
 0xc1d   : > { %v2719_v1 = vpop.eup %2718 }
 0xc1e   : > { %v1911_v3 = vmul.f32 %v2719_v1, %v1904_v60 }
 0xc20   : > { %v1918_v4 = vmul.f32 %v2188_v2, %v1911_v3 }
 0xc22   : > { %v1925_v5 = vadd.f32 %v2189_v38, %v1918_v4 }
 0xc24   : > { %1926 = vst [vmem:[%s3239_s20] sm:$0xff] %v1925_v5 }
 0xc25 PF: > { %s3669_s3 = sld [smem:[#allocation13_spill]]  ;;  %s3670_s29 = sld [smem:[#allocation9_spill]] }
 0xc26   : > { %s3671_s30 = sld [smem:[#allocation10_spill]]  ;;  %s3672_s15 = sld [smem:[#allocation16_spill]] }
 0xc27   : > { %s3673_s16 = sld [smem:[#allocation11_spill]]  ;;  %s3674_s17 = sld [smem:[#allocation12_spill]] }
 0xc28   : > { %s3675_s18 = sld [smem:[#allocation14_spill]]  ;;  %s3676_s19 = sld [smem:[#allocation15_spill]] }
 0xc2b   : > { %s30_s20 = sadd.s32 1, %s3669_s3  }
 0xc2c   : > { %p27_p0 = scmp.ge.s32.totalorder %s30_s20, 6  }
 0xc2e   :  { %29 = sbr.rel (!%p27_p0) target bundleno = 22 (0x16), region = 177 }
 0xc35   :  { %1946 = vsyncpa [#allocation3], 1 }
 0xc36   :  { %1948 = vsyncpa [#allocation3 + $0x1], 1 }
 0xc37   :  { %1949 = vsyncpa [#allocation5], 1 }
 0xc38   :  { %1951 = vsyncpa [#allocation5 + $0x1], 1 }

</bundles_post_ra>
